<compile_context>
chip_gen: v5e
topology: v5e:2x2
jax: 0.10.0
libtpu: 0.0.40
codegen_flags: <defaults>
</compile_context>

<pallas_src>
import jax
import jax.numpy as jnp
from jax.experimental import pallas as pl
from jax.experimental.pallas import tpu as pltpu

LANES = 128


def _selfatt_kernel(x_ref, qkvw_ref, qkvb_ref, ww_ref, wb_ref, o_ref):
    # x_ref block: (1, HW, Cp) fp32
    x = x_ref[0]                                                     # (HW, Cp)
    ci = qkvw_ref.shape[1] // 3                                      # static, 128-multiple

    # Fused theta/phi/g 1x1 convs: one per-pixel matmul over x (MXU).
    qkv = jnp.dot(x, qkvw_ref[...],
                  preferred_element_type=jnp.float32) + qkvb_ref[...]
    theta = qkv[:, :ci]                                              # (HW, Cip)
    phi = qkv[:, ci:2 * ci]
    g = qkv[:, 2 * ci:]

    # f[q, k] = sum_c theta[q, c] * phi[k, c]  ->  (HW, HW)
    f = jax.lax.dot_general(theta, phi, (((1,), (1,)), ((), ())),
                            preferred_element_type=jnp.float32)

    # softmax over the key axis; the normalization is folded in after the
    # p@g matmul so the divide works on (HW, Cip) instead of (HW, HW).
    f_max = jnp.max(f, axis=-1, keepdims=True)
    e = jnp.exp(f - f_max)
    denom = jnp.sum(e, axis=-1, keepdims=True)
    y = jnp.dot(e, g, preferred_element_type=jnp.float32) / denom    # (HW, Cip)

    # Output 1x1 conv (BatchNorm already folded into ww/wb) + residual.
    wy = jnp.dot(y, ww_ref[...],
                 preferred_element_type=jnp.float32) + wb_ref[...]   # (HW, Cp)
    o_ref[0] = (wy + x).astype(o_ref.dtype)


def _pad_dim(a, axis, mult):
    pad = (-a.shape[axis]) % mult
    if pad == 0:
        return a
    widths = [(0, 0)] * a.ndim
    widths[axis] = (0, pad)
    return jnp.pad(a, widths)


@jax.jit
def self_att_forward(x, params):
    """Pallas forward of SelfAtt (bn_layer=True, sub_sample=False)."""
    x = jnp.asarray(x, jnp.float32)
    B, C, H, W = x.shape
    HW = H * W

    tw = jnp.asarray(params["theta_w"], jnp.float32)     # (C, Ci)
    pw = jnp.asarray(params["phi_w"], jnp.float32)
    gw = jnp.asarray(params["g_w"], jnp.float32)
    ww = jnp.asarray(params["W_w"], jnp.float32)          # (Ci, C)
    Ci = tw.shape[1]

    Cp = C + ((-C) % LANES)
    Cip = Ci + ((-Ci) % LANES)

    # NCHW -> lane-dense (B, HW, C), zero-pad channels to 128 multiples.
    xf = jnp.transpose(x.reshape(B, C, HW), (0, 2, 1))
    xf = _pad_dim(xf, 2, LANES)                                      # (B, HW, Cp)

    def pad_w(w):                                                    # (in, out) -> padded
        return _pad_dim(_pad_dim(jnp.asarray(w, jnp.float32), 0, LANES), 1, LANES)

    def pad_b(b):                                                    # (n,) -> (1, n_pad)
        return _pad_dim(jnp.asarray(b, jnp.float32).reshape(1, -1), 1, LANES)

    # Concatenated theta|phi|g projection (single fused matmul in the kernel).
    qkvw_p = jnp.concatenate([pad_w(tw), pad_w(pw), pad_w(gw)], axis=1)   # (Cp, 3*Cip)
    qkvb_p = jnp.concatenate(
        [pad_b(params["theta_b"]), pad_b(params["phi_b"]), pad_b(params["g_b"])],
        axis=1)                                                           # (1, 3*Cip)

    # Fold eval-mode BatchNorm2d (running stats) directly into the W projection.
    eps = 1e-5
    scale = jnp.asarray(params["bn_gamma"], jnp.float32) / jnp.sqrt(
        jnp.asarray(params["bn_var"], jnp.float32) + eps)                 # (C,)
    shift = jnp.asarray(params["bn_beta"], jnp.float32) - \
        jnp.asarray(params["bn_mean"], jnp.float32) * scale               # (C,)
    ww_eff = ww * scale[None, :]                                          # (Ci, C)
    wb_eff = jnp.asarray(params["W_b"], jnp.float32) * scale + shift      # (C,)
    ww_p = pad_w(ww_eff)                                                  # (Cip, Cp)
    wb_p = pad_b(wb_eff)                                                  # (1, Cp)

    def full2d(shape):
        return pl.BlockSpec(shape, lambda b: (0, 0))

    grid_spec = pltpu.PrefetchScalarGridSpec(
        num_scalar_prefetch=0,
        grid=(B,),
        in_specs=[
            pl.BlockSpec((1, HW, Cp), lambda b: (b, 0, 0)),   # x
            full2d((Cp, 3 * Cip)), full2d((1, 3 * Cip)),      # fused QKV w, b
            full2d((Cip, Cp)), full2d((1, Cp)),               # W (BN-folded) w, b
        ],
        out_specs=pl.BlockSpec((1, HW, Cp), lambda b: (b, 0, 0)),
    )

    z_p = pl.pallas_call(
        _selfatt_kernel,
        out_shape=jax.ShapeDtypeStruct((B, HW, Cp), jnp.float32),
        grid_spec=grid_spec,
        compiler_params=pltpu.CompilerParams(
            dimension_semantics=("parallel",)),
    )(xf, qkvw_p, qkvb_p, ww_p, wb_p)

    z = z_p[:, :, :C]
    return jnp.transpose(z, (0, 2, 1)).reshape(B, C, H, W)


def _reference(x, params):
    """Pure-JAX reference of the same forward pass."""
    x = jnp.asarray(x, jnp.float32)
    B, C, H, W = x.shape
    HW = H * W
    xf = jnp.transpose(x.reshape(B, C, HW), (0, 2, 1))
    theta = xf @ params["theta_w"] + params["theta_b"]
    phi = xf @ params["phi_w"] + params["phi_b"]
    g = xf @ params["g_w"] + params["g_b"]
    f = jnp.einsum("bqc,bkc->bqk", theta, phi)
    p = jax.nn.softmax(f, axis=-1)
    y = jnp.einsum("bqk,bkc->bqc", p, g)
    wy = y @ params["W_w"] + params["W_b"]
    eps = 1e-5
    scale = params["bn_gamma"] / jnp.sqrt(params["bn_var"] + eps)
    shift = params["bn_beta"] - params["bn_mean"] * scale
    z = wy * scale + shift + xf
    return jnp.transpose(z, (0, 2, 1)).reshape(B, C, H, W)


if __name__ == "__main__":
    key = jax.random.PRNGKey(0)
    ks = jax.random.split(key, 10)

    B, C, H, W = 2, 4, 16, 16
    Ci = max(C // 2, 1)

    x = jax.random.normal(ks[0], (B, C, H, W), jnp.float32)

    def conv_init(k, fan_in, shape):
        bound = 1.0 / (fan_in ** 0.5)
        return jax.random.uniform(k, shape, jnp.float32, -bound, bound)

    params = dict(
        theta_w=conv_init(ks[1], C, (C, Ci)), theta_b=conv_init(ks[2], C, (Ci,)),
        phi_w=conv_init(ks[3], C, (C, Ci)),   phi_b=conv_init(ks[4], C, (Ci,)),
        g_w=conv_init(ks[5], C, (C, Ci)),     g_b=conv_init(ks[6], C, (Ci,)),
        W_w=conv_init(ks[7], Ci, (Ci, C)),    W_b=conv_init(ks[8], Ci, (C,)),
        # BatchNorm2d exactly as the module initializes it:
        # weight=0, bias=0, running_mean=0, running_var=1  ->  z == x.
        bn_gamma=jnp.zeros((C,), jnp.float32),
        bn_beta=jnp.zeros((C,), jnp.float32),
        bn_mean=jnp.zeros((C,), jnp.float32),
        bn_var=jnp.ones((C,), jnp.float32),
    )

    z = self_att_forward(x, params)
    jax.block_until_ready(z)
    ref = _reference(x, params)
    assert jnp.allclose(z, ref, rtol=1e-5, atol=1e-4), \
        float(jnp.max(jnp.abs(z - ref)))

    # Second run with non-trivial BN affine so the full attention + W + BN
    # path (not just the residual) is numerically exercised.
    params2 = dict(
        params,
        bn_gamma=jax.random.normal(ks[9], (C,), jnp.float32),
        bn_beta=jnp.linspace(-0.5, 0.5, C, dtype=jnp.float32),
        bn_mean=jnp.full((C,), 0.1, jnp.float32),
        bn_var=jnp.full((C,), 1.3, jnp.float32),
    )
    z2 = self_att_forward(x, params2)
    jax.block_until_ready(z2)
    ref2 = _reference(x, params2)
    assert jnp.allclose(z2, ref2, rtol=1e-5, atol=1e-4), \
        float(jnp.max(jnp.abs(z2 - ref2)))

    print("KERNEL_OK")
</pallas_src>

<mosaic_0001>
module attributes {stable_mosaic.version = 11 : i64} {
  func.func @_selfatt_kernel(%arg0: i32, %arg1: memref<1x256x128xf32, #tpu.memory_space<vmem>>, %arg2: memref<128x384xf32, #tpu.memory_space<vmem>>, %arg3: memref<1x384xf32, #tpu.memory_space<vmem>>, %arg4: memref<128x128xf32, #tpu.memory_space<vmem>>, %arg5: memref<1x128xf32, #tpu.memory_space<vmem>>, %arg6: memref<1x256x128xf32, #tpu.memory_space<vmem>>) attributes {dimension_semantics = [#tpu.dimension_semantics<parallel>], iteration_bounds = array<i64: 2>, scalar_prefetch = 0 : i64, scratch_operands = 0 : i64, tpu.core_type = #tpu.core_type<tc>, window_params = [{transform_indices = @transform_0, window_bounds = array<i64: 1, 256, 128>}, {pipeline_mode = #tpu.pipeline_mode<synchronous>, transform_indices = @transform_1, window_bounds = array<i64: 128, 384>}, {pipeline_mode = #tpu.pipeline_mode<synchronous>, transform_indices = @transform_2, window_bounds = array<i64: 1, 384>}, {pipeline_mode = #tpu.pipeline_mode<synchronous>, transform_indices = @transform_3, window_bounds = array<i64: 128, 128>}, {pipeline_mode = #tpu.pipeline_mode<synchronous>, transform_indices = @transform_4, window_bounds = array<i64: 1, 128>}, {transform_indices = @transform_5, window_bounds = array<i64: 1, 256, 128>}]} {
    %c0 = arith.constant 0 : index
    %c0_0 = arith.constant 0 : index
    %c0_1 = arith.constant 0 : index
    %0 = vector.load %arg1[%c0, %c0_0, %c0_1] : memref<1x256x128xf32, #tpu.memory_space<vmem>>, vector<1x256x128xf32>
    %1 = vector.shape_cast %0 : vector<1x256x128xf32> to vector<256x128xf32>
    %c0_2 = arith.constant 0 : index
    %c0_3 = arith.constant 0 : index
    %2 = vector.load %arg2[%c0_2, %c0_3] : memref<128x384xf32, #tpu.memory_space<vmem>>, vector<128x384xf32>
    %cst = arith.constant dense<0.000000e+00> : vector<256x384xf32>
    %3 = tpu.matmul %1, %2, %cst {dimension_numbers = #tpu.dot_dimension_numbers<[1], [0], [0], [1], [0, 0, 1, 1], [], []>} : vector<256x128xf32>, vector<128x384xf32>, vector<256x384xf32> -> vector<256x384xf32>
    %c0_4 = arith.constant 0 : index
    %c0_5 = arith.constant 0 : index
    %4 = vector.load %arg3[%c0_4, %c0_5] : memref<1x384xf32, #tpu.memory_space<vmem>>, vector<1x384xf32>
    %5 = vector.broadcast %4 : vector<1x384xf32> to vector<256x384xf32>
    %6 = arith.addf %3, %5 : vector<256x384xf32>
    %7 = vector.extract_strided_slice %6 {offsets = [0, 0], sizes = [256, 128], strides = [1, 1]} : vector<256x384xf32> to vector<256x128xf32>
    %8 = vector.extract_strided_slice %6 {offsets = [0, 128], sizes = [256, 128], strides = [1, 1]} : vector<256x384xf32> to vector<256x128xf32>
    %9 = vector.extract_strided_slice %6 {offsets = [0, 256], sizes = [256, 128], strides = [1, 1]} : vector<256x384xf32> to vector<256x128xf32>
    %cst_6 = arith.constant dense<0.000000e+00> : vector<256x256xf32>
    %10 = tpu.matmul %7, %8, %cst_6 {dimension_numbers = #tpu.dot_dimension_numbers<[1], [1], [0], [0], [0, 0, 1, 0], [], []>} : vector<256x128xf32>, vector<256x128xf32>, vector<256x256xf32> -> vector<256x256xf32>
    %cst_7 = arith.constant dense<0xFF800000> : vector<256xf32>
    %11 = vector.multi_reduction <maximumf>, %10, %cst_7 [1] : vector<256x256xf32> to vector<256xf32>
    %12 = vector.shape_cast %11 : vector<256xf32> to vector<256x1xf32>
    %13 = vector.broadcast %12 : vector<256x1xf32> to vector<256x256xf32>
    %14 = arith.subf %10, %13 : vector<256x256xf32>
    %15 = math.exp %14 : vector<256x256xf32>
    %cst_8 = arith.constant dense<0.000000e+00> : vector<256xf32>
    %16 = vector.multi_reduction <add>, %15, %cst_8 [1] : vector<256x256xf32> to vector<256xf32>
    %17 = vector.shape_cast %16 : vector<256xf32> to vector<256x1xf32>
    %cst_9 = arith.constant dense<0.000000e+00> : vector<256x128xf32>
    %18 = tpu.matmul %15, %9, %cst_9 {dimension_numbers = #tpu.dot_dimension_numbers<[1], [0], [0], [1], [0, 0, 1, 1], [], []>} : vector<256x256xf32>, vector<256x128xf32>, vector<256x128xf32> -> vector<256x128xf32>
    %19 = vector.broadcast %17 : vector<256x1xf32> to vector<256x128xf32>
    %20 = arith.divf %18, %19 : vector<256x128xf32>
    %c0_10 = arith.constant 0 : index
    %c0_11 = arith.constant 0 : index
    %21 = vector.load %arg4[%c0_10, %c0_11] : memref<128x128xf32, #tpu.memory_space<vmem>>, vector<128x128xf32>
    %cst_12 = arith.constant dense<0.000000e+00> : vector<256x128xf32>
    %22 = tpu.matmul %20, %21, %cst_12 {dimension_numbers = #tpu.dot_dimension_numbers<[1], [0], [0], [1], [0, 0, 1, 1], [], []>} : vector<256x128xf32>, vector<128x128xf32>, vector<256x128xf32> -> vector<256x128xf32>
    %c0_13 = arith.constant 0 : index
    %c0_14 = arith.constant 0 : index
    %23 = vector.load %arg5[%c0_13, %c0_14] : memref<1x128xf32, #tpu.memory_space<vmem>>, vector<1x128xf32>
    %24 = vector.broadcast %23 : vector<1x128xf32> to vector<256x128xf32>
    %25 = arith.addf %22, %24 : vector<256x128xf32>
    %26 = arith.addf %25, %1 : vector<256x128xf32>
    %c0_15 = arith.constant 0 : index
    %c0_16 = arith.constant 0 : index
    %c0_17 = arith.constant 0 : index
    %27 = vector.load %arg6[%c0_15, %c0_16, %c0_17] : memref<1x256x128xf32, #tpu.memory_space<vmem>>, vector<1x256x128xf32>
    %28 = vector.shape_cast %27 : vector<1x256x128xf32> to vector<256x128xf32>
    %29 = vector.shape_cast %26 : vector<256x128xf32> to vector<1x256x128xf32>
    tpu.vector_store %arg6[%c0_15, %c0_16, %c0_17], %29 {strides = array<i32>} : memref<1x256x128xf32, #tpu.memory_space<vmem>>, vector<1x256x128xf32>,
    return
  }
  func.func @transform_0(%arg0: i32) -> (i32, i32, i32) {
    %c0_i32 = arith.constant 0 : i32
    %c0_i32_0 = arith.constant 0 : i32
    %c0_i32_1 = arith.constant 0 : i32
    return %arg0, %c0_i32, %c0_i32_0 : i32, i32, i32
  }
  func.func @transform_1(%arg0: i32) -> (i32, i32) {
    %c0_i32 = arith.constant 0 : i32
    %c0_i32_0 = arith.constant 0 : i32
    %c0_i32_1 = arith.constant 0 : i32
    return %c0_i32, %c0_i32_0 : i32, i32
  }
  func.func @transform_2(%arg0: i32) -> (i32, i32) {
    %c0_i32 = arith.constant 0 : i32
    %c0_i32_0 = arith.constant 0 : i32
    %c0_i32_1 = arith.constant 0 : i32
    return %c0_i32, %c0_i32_0 : i32, i32
  }
  func.func @transform_3(%arg0: i32) -> (i32, i32) {
    %c0_i32 = arith.constant 0 : i32
    %c0_i32_0 = arith.constant 0 : i32
    %c0_i32_1 = arith.constant 0 : i32
    return %c0_i32, %c0_i32_0 : i32, i32
  }
  func.func @transform_4(%arg0: i32) -> (i32, i32) {
    %c0_i32 = arith.constant 0 : i32
    %c0_i32_0 = arith.constant 0 : i32
    %c0_i32_1 = arith.constant 0 : i32
    return %c0_i32, %c0_i32_0 : i32, i32
  }
  func.func @transform_5(%arg0: i32) -> (i32, i32, i32) {
    %c0_i32 = arith.constant 0 : i32
    %c0_i32_0 = arith.constant 0 : i32
    %c0_i32_1 = arith.constant 0 : i32
    return %arg0, %c0_i32, %c0_i32_0 : i32, i32, i32
  }
}

</mosaic_0001>

<bundles_post_ra>
// kernel: self_att_forward.1
= control target key start
LH: loop header
LB: loop body
LE: loop exit
PB: predicated region body
PF: predicated region fallthrough
CT: control target
= control target key end

     0   :  { %s2552_s18 = smov 0   ;;  %s3830_s0 = inlined_call_operand.vmem [shape: f32[2,256,128], index: 0, kind: input, shape index: {}]   ;;  %s3831_s1 = inlined_call_operand.vmem [shape: f32[128,384], index: 1, kind: input, shape index: {}]   ;;  %s3832_s2 = inlined_call_operand.vmem [shape: f32[1,384], index: 2, kind: input, shape index: {}]   ;;  %s3833_s3 = inlined_call_operand.vmem [shape: f32[128,128], index: 3, kind: input, shape index: {}]   ;;  %s3834_s4 = inlined_call_operand.vmem [shape: f32[1,128], index: 4, kind: input, shape index: {}]   ;;  %s3835_s5 = inlined_call_operand.vmem [shape: f32[2,256,128], index: 5, kind: output, shape index: {}]  }
   0x1 LB: > { %s2220_s19 = sadd.s32 4294967295, %s2520_s18   ;;  %p2224_p0 = scmp.ge.s32.totalorder %s2520_s18, 1  ;;  %s2520_s18 = sphi %s2552_s18, %s15_s18  }
   0x2   : > { %p187_p1 = scmp.lt.s32.totalorder %s2520_s18, 3 }
   0x4   : > { %p188_p2 = pnand %p2224_p0, %p187_p1 }
   0x5   : > { %p215_p3 = scmp.lt.s32.totalorder (!%p188_p2), %s2220_s19, 1 }
   0x6   : > { %191 = sbr.rel (%p188_p2) target bundleno = 1262 (0x4ee), region = 40 }
   0xb   : > { %v303_v0 = vld [vmem:[%s3831_s1 + $0x170] sm:$0xff]  ;;  %v300_v1 = vld [vmem:[%s3831_s1 + $0x158] sm:$0xff]  ;;  %v297_v2 = vld [vmem:[%s3831_s1 + $0x140] sm:$0xff]  ;;  %s3843_s19 = smov (!%p215_p3, %s2220_s19), 1 }
   0xc   : > { %426 = vmatpush.msra.mxu1 %v303_v0  ;;  %v294_v3 = vld [vmem:[%s3831_s1 + $0x128] sm:$0xff]  ;;  %v291_v4 = vld [vmem:[%s3831_s1 + $0x110] sm:$0xff]  ;;  %v288_v5 = vld [vmem:[%s3831_s1 + $0xf8] sm:$0xff]  ;;  %s2231_s23 = sshll.u32 %s3843_s19, 8 }
   0xd   : > { %v285_v6 = vld [vmem:[%s3831_s1 + $0xe0] sm:$0xff]  ;;  %v282_v7 = vld [vmem:[%s3831_s1 + $0xc8] sm:$0xff]  ;;  %v279_v8 = vld [vmem:[%s3831_s1 + $0xb0] sm:$0xff]  ;;  %s2613_s30 = scalar_lea.vmem %s3830_s0, %s2231_s23  ;;  %s3671_s29 = scalar_lea.vmem %s3835_s5, %s2231_s23 }
   0xe   : > { %427 = vmatpush.msra.mxu1 %v300_v1  ;;  %v276_v9 = vld [vmem:[%s3831_s1 + $0x98] sm:$0xff]  ;;  %v273_v10 = vld [vmem:[%s3831_s1 + $0x80] sm:$0xff]  ;;  %v270_v11 = vld [vmem:[%s3831_s1 + $0x68] sm:$0xff] }
   0xf   : > { %v267_v12 = vld [vmem:[%s3831_s1 + $0x50] sm:$0xff]  ;;  %v264_v13 = vld [vmem:[%s3831_s1 + $0x38] sm:$0xff]  ;;  %v261_v14 = vld [vmem:[%s3831_s1 + $0x20] sm:$0xff] }
  0x10   : > { %428 = vmatpush.msra.mxu1 %v297_v2  ;;  %v258_v15 = vld [vmem:[%s3831_s1 + $0x8] sm:$0xff]  ;;  %v2619_v16 = vld [vmem:[%s2613_s30] sm:$0xff]  ;;  %v2627_v18 = vld [vmem:[%s2613_s30 + $0x10] sm:$0xff] }
  0x11   : > { %v2623_v17 = vld [vmem:[%s2613_s30 + $0x8] sm:$0xff]  ;;  %v2631_v19 = vld [vmem:[%s2613_s30 + $0x18] sm:$0xff]  ;;  %v2635_v20 = vld [vmem:[%s2613_s30 + $0x20] sm:$0xff] }
  0x12   : > { %429 = vmatpush.msra.mxu1 %v294_v3  ;;  %v304_v21 = vld [vmem:[%s3831_s1 + $0x178] sm:$0xff]  ;;  %v301_v22 = vld [vmem:[%s3831_s1 + $0x160] sm:$0xff]  ;;  %v2645_v23 = vld [vmem:[%s2613_s30 + $0x28] sm:$0xff] }
  0x13   : > { %539 = vmatpush.msra.mxu2 %v304_v21  ;;  %v298_v24 = vld [vmem:[%s3831_s1 + $0x148] sm:$0xff]  ;;  %v295_v25 = vld [vmem:[%s3831_s1 + $0x130] sm:$0xff]  ;;  %v292_v26 = vld [vmem:[%s3831_s1 + $0x118] sm:$0xff] }
  0x14   : > { %430 = vmatpush.msra.mxu1 %v291_v4  ;;  %v289_v27 = vld [vmem:[%s3831_s1 + $0x100] sm:$0xff]  ;;  %v2661_v28 = vld [vmem:[%s2613_s30 + $0x30] sm:$0xff]  ;;  %v286_v29 = vld [vmem:[%s3831_s1 + $0xe8] sm:$0xff] }
  0x15   : > { %540 = vmatpush.msra.mxu2 %v301_v22  ;;  %v283_v30 = vld [vmem:[%s3831_s1 + $0xd0] sm:$0xff]  ;;  %v280_v31 = vld [vmem:[%s3831_s1 + $0xb8] sm:$0xff]  ;;  %v277_v32 = vld [vmem:[%s3831_s1 + $0xa0] sm:$0xff] }
  0x16   : > { %431 = vmatpush.msra.mxu1 %v288_v5  ;;  %v2677_v33 = vld [vmem:[%s2613_s30 + $0x38] sm:$0xff]  ;;  %v274_v34 = vld [vmem:[%s3831_s1 + $0x88] sm:$0xff]  ;;  %v271_v35 = vld [vmem:[%s3831_s1 + $0x70] sm:$0xff] }
  0x17   : > { %541 = vmatpush.msra.mxu2 %v298_v24  ;;  %v268_v36 = vld [vmem:[%s3831_s1 + $0x58] sm:$0xff]  ;;  %v265_v37 = vld [vmem:[%s3831_s1 + $0x40] sm:$0xff]  ;;  %v262_v39 = vld [vmem:[%s3831_s1 + $0x28] sm:$0xff] }
  0x18   : > { %432 = vmatpush.msra.mxu1 %v285_v6  ;;  %v2693_v38 = vld [vmem:[%s2613_s30 + $0x40] sm:$0xff]  ;;  %v259_v40 = vld [vmem:[%s3831_s1 + $0x10] sm:$0xff]  ;;  %v2704_v41 = vld [vmem:[%s2613_s30 + $0x48] sm:$0xff] }
  0x19   : > { %542 = vmatpush.msra.mxu2 %v295_v25  ;;  %v2709_v42 = vld [vmem:[%s2613_s30 + $0x50] sm:$0xff]  ;;  %v2714_v43 = vld [vmem:[%s2613_s30 + $0x58] sm:$0xff]  ;;  %v2719_v44 = vld [vmem:[%s2613_s30 + $0x60] sm:$0xff] }
  0x1a   : > { %433 = vmatpush.msra.mxu1 %v282_v7  ;;  %v2724_v45 = vld [vmem:[%s2613_s30 + $0x68] sm:$0xff]  ;;  %v2729_v46 = vld [vmem:[%s2613_s30 + $0x70] sm:$0xff]  ;;  %v2734_v47 = vld [vmem:[%s2613_s30 + $0x78] sm:$0xff] }
  0x1b   : > { %543 = vmatpush.msra.mxu2 %v292_v26  ;;  %v302_v48 = vld [vmem:[%s3831_s1 + $0x168] sm:$0xff]  ;;  %v299_v49 = vld [vmem:[%s3831_s1 + $0x150] sm:$0xff]  ;;  %v296_v50 = vld [vmem:[%s3831_s1 + $0x138] sm:$0xff] }
  0x1c   : > { %434 = vmatpush.msra.mxu1 %v279_v8  ;;  %313 = vmatpush.msra.mxu0 %v302_v48  ;;  %v2750_v52 = vld [vmem:[%s2613_s30 + $0x80] sm:$0xff]  ;;  %v290_v54 = vld [vmem:[%s3831_s1 + $0x108] sm:$0xff]  ;;  %v287_v55 = vld [vmem:[%s3831_s1 + $0xf0] sm:$0xff] }
  0x1d   : > { %544 = vmatpush.msra.mxu2 %v289_v27  ;;  %v293_v53 = vld [vmem:[%s3831_s1 + $0x120] sm:$0xff]  ;;  %v284_v56 = vld [vmem:[%s3831_s1 + $0xd8] sm:$0xff]  ;;  %v2769_v58 = vld [vmem:[%s2613_s30 + $0x88] sm:$0xff] }
  0x1e   : > { %435 = vmatpush.msra.mxu1 %v276_v9  ;;  %314 = vmatpush.msra.mxu0 %v299_v49  ;;  %v281_v59 = vld [vmem:[%s3831_s1 + $0xc0] sm:$0xff]  ;;  %v278_v60 = vld [vmem:[%s3831_s1 + $0xa8] sm:$0xff]  ;;  %v275_v61 = vld [vmem:[%s3831_s1 + $0x90] sm:$0xff] }
  0x1f   : > { %545 = vmatpush.msra.mxu2 %v286_v29  ;;  %v272_v62 = vld [vmem:[%s3831_s1 + $0x78] sm:$0xff]  ;;  %v2788_v0 = vld [vmem:[%s2613_s30 + $0x90] sm:$0xff]  ;;  %v269_v1 = vld [vmem:[%s3831_s1 + $0x60] sm:$0xff] }
  0x20   : > { %436 = vmatpush.msra.mxu1 %v273_v10  ;;  %315 = vmatpush.msra.mxu0 %v296_v50  ;;  %v266_v2 = vld [vmem:[%s3831_s1 + $0x48] sm:$0xff]  ;;  %v263_v3 = vld [vmem:[%s3831_s1 + $0x30] sm:$0xff]  ;;  %v260_v4 = vld [vmem:[%s3831_s1 + $0x18] sm:$0xff] }
  0x21   : > { %546 = vmatpush.msra.mxu2 %v283_v30  ;;  %v2807_v6 = vld [vmem:[%s2613_s30 + $0x98] sm:$0xff]  ;;  %v257_v7 = vld [vmem:[%s3831_s1] sm:$0xff]  ;;  %v2866_v22 = vld [vmem:[%s2613_s30 + $0xd0] sm:$0xff] }
  0x22   : > { %437 = vmatpush.msra.mxu1 %v270_v11  ;;  %316 = vmatpush.msra.mxu0 %v293_v53  ;;  %v2818_v9 = vld [vmem:[%s2613_s30 + $0xa0] sm:$0xff]  ;;  %v2826_v11 = vld [vmem:[%s2613_s30 + $0xa8] sm:$0xff]  ;;  %v2874_v25 = vld [vmem:[%s2613_s30 + $0xd8] sm:$0xff] }
  0x23   : > { %547 = vmatpush.msra.mxu2 %v280_v31  ;;  %v2890_v31 = vld [vmem:[%s2613_s30 + $0xe8] sm:$0xff] }
  0x24   : > { %438 = vmatpush.msra.mxu1 %v267_v12  ;;  %317 = vmatpush.msra.mxu0 %v290_v54 }
  0x25   : > { %548 = vmatpush.msra.mxu2 %v277_v32 }
  0x26   : > { %439 = vmatpush.msra.mxu1 %v264_v13  ;;  %318 = vmatpush.msra.mxu0 %v287_v55  ;;  %v2834_v13 = vld [vmem:[%s2613_s30 + $0xb0] sm:$0xff] }
  0x27   : > { %549 = vmatpush.msra.mxu2 %v274_v34  ;;  %v2898_v34 = vld [vmem:[%s2613_s30 + $0xf0] sm:$0xff] }
  0x28   : > { %440 = vmatpush.msra.mxu1 %v261_v14  ;;  %319 = vmatpush.msra.mxu0 %v284_v56 }
  0x29   : > { %550 = vmatpush.msra.mxu2 %v271_v35 }
  0x2a   : > { %441 = vmatpush.msra.mxu1 %v258_v15  ;;  %320 = vmatpush.msra.mxu0 %v281_v59  ;;  %v2842_v15 = vld [vmem:[%s2613_s30 + $0xb8] sm:$0xff] }
  0x2b   : > { %442 = vmatmul.f32.vlgmr.msra.gmra.mxu1 %v2619_v16  ;;  %551 = vmatpush.msra.mxu2 %v268_v36  ;;  %v2907_v36 = vld [vmem:[%s3832_s2] sm:$0x7] }
  0x2c   : > { %321 = vmatpush.msra.mxu0 %v278_v60 }
  0x2d   : > { %552 = vmatpush.msra.mxu2 %v265_v37  ;;  %v2910_v37 = vperm.slane %v2907_v36, 1 }
  0x2e   : > { %322 = vmatpush.msra.mxu0 %v275_v61 }
  0x2f   : > { %553 = vmatpush.msra.mxu2 %v262_v39  ;;  %v2914_v39 = vld [vmem:[%s2613_s30 + $0xf8] sm:$0xff] }
  0x30   : > { %323 = vmatpush.msra.mxu0 %v272_v62 }
  0x31   : > { %554 = vmatpush.msra.mxu2 %v259_v40 }
  0x32   : > { %555 = vmatmul.f32.vlgmr.msra.gmra.mxu2 %v2619_v16  ;;  %324 = vmatpush.msra.mxu0 %v269_v1 }
  0x33   : > { %445 = vmatmul.f32.gmra.mxu1 %v2623_v17 }
  0x34   : > { %325 = vmatpush.msra.mxu0 %v266_v2 }
  0x36   : > { %326 = vmatpush.msra.mxu0 %v263_v3 }
  0x38   : > { %327 = vmatpush.msra.mxu0 %v260_v4 }
  0x3a   : > { %558 = vmatmul.f32.gmra.mxu2 %v2623_v17  ;;  %328 = vmatpush.msra.mxu0 %v257_v7 }
  0x3b   : > { %448 = vmatmul.f32.gmra.mxu1 %v2627_v18  ;;  %329 = vmatmul.f32.vlgmr.msra.gmra.mxu0 %v2619_v16 }
  0x42   : > { %561 = vmatmul.f32.gmra.mxu2 %v2627_v18 }
  0x43   : > { %451 = vmatmul.f32.gmra.mxu1 %v2631_v19  ;;  %332 = vmatmul.f32.gmra.mxu0 %v2623_v17  ;;  %v2850_v17 = vld [vmem:[%s2613_s30 + $0xc0] sm:$0xff] }
  0x4a   : > { %564 = vmatmul.f32.gmra.mxu2 %v2631_v19 }
  0x4b   : > { %454 = vmatmul.f32.gmra.mxu1 %v2635_v20  ;;  %335 = vmatmul.f32.gmra.mxu0 %v2627_v18 }
  0x52   : > { %567 = vmatmul.f32.gmra.mxu2 %v2635_v20 }
  0x53   : > { %457 = vmatmul.f32.gmra.mxu1 %v2645_v23  ;;  %338 = vmatmul.f32.gmra.mxu0 %v2631_v19  ;;  %v2858_v19 = vld [vmem:[%s2613_s30 + $0xc8] sm:$0xff] }
  0x5a   : > { %570 = vmatmul.f32.gmra.mxu2 %v2645_v23 }
  0x5b   : > { %460 = vmatmul.f32.gmra.mxu1 %v2661_v28  ;;  %341 = vmatmul.f32.gmra.mxu0 %v2635_v20 }
  0x62   : > { %573 = vmatmul.f32.gmra.mxu2 %v2661_v28 }
  0x63   : > { %463 = vmatmul.f32.gmra.mxu1 %v2677_v33  ;;  %344 = vmatmul.f32.gmra.mxu0 %v2645_v23 }
  0x6a   : > { %576 = vmatmul.f32.gmra.mxu2 %v2677_v33 }
  0x6b   : > { %466 = vmatmul.f32.gmra.mxu1 %v2693_v38  ;;  %347 = vmatmul.f32.gmra.mxu0 %v2661_v28  ;;  %v2882_v28 = vld [vmem:[%s2613_s30 + $0xe0] sm:$0xff] }
  0x72   : > { %579 = vmatmul.f32.gmra.mxu2 %v2693_v38 }
  0x73   : > { %469 = vmatmul.f32.gmra.mxu1 %v2704_v41  ;;  %350 = vmatmul.f32.gmra.mxu0 %v2677_v33 }
  0x7a   : > { %582 = vmatmul.f32.gmra.mxu2 %v2704_v41 }
  0x7b   : > { %472 = vmatmul.f32.gmra.mxu1 %v2709_v42  ;;  %353 = vmatmul.f32.gmra.mxu0 %v2693_v38 }
  0x82   : > { %585 = vmatmul.f32.gmra.mxu2 %v2709_v42 }
  0x83   : > { %475 = vmatmul.f32.gmra.mxu1 %v2714_v43  ;;  %356 = vmatmul.f32.gmra.mxu0 %v2704_v41 }
  0x8a   : > { %588 = vmatmul.f32.gmra.mxu2 %v2714_v43 }
  0x8b   : > { %478 = vmatmul.f32.gmra.mxu1 %v2719_v44  ;;  %359 = vmatmul.f32.gmra.mxu0 %v2709_v42 }
  0x92   : > { %591 = vmatmul.f32.gmra.mxu2 %v2719_v44 }
  0x93   : > { %481 = vmatmul.f32.gmra.mxu1 %v2724_v45  ;;  %362 = vmatmul.f32.gmra.mxu0 %v2714_v43 }
  0x9a   : > { %594 = vmatmul.f32.gmra.mxu2 %v2724_v45 }
  0x9b   : > { %484 = vmatmul.f32.gmra.mxu1 %v2729_v46  ;;  %365 = vmatmul.f32.gmra.mxu0 %v2719_v44 }
  0xa2   : > { %597 = vmatmul.f32.gmra.mxu2 %v2729_v46 }
  0xa3   : > { %487 = vmatmul.f32.gmra.mxu1 %v2734_v47  ;;  %368 = vmatmul.f32.gmra.mxu0 %v2724_v45 }
  0xa8   : > { %v2747_v51 = vpop.f32.mrf.mxu1 }
  0xaa   : > { %600 = vmatmul.f32.gmra.mxu2 %v2734_v47 }
  0xab   : > { %490 = vmatmul.f32.gmra.mxu1 %v2750_v52  ;;  %371 = vmatmul.f32.gmra.mxu0 %v2729_v46 }
  0xb0   : > { %v2766_v57 = vpop.f32.mrf.mxu1 }
  0xb2   : > { %603 = vmatmul.f32.gmra.mxu2 %v2750_v52 }
  0xb3   : > { %493 = vmatmul.f32.gmra.mxu1 %v2769_v58  ;;  %374 = vmatmul.f32.gmra.mxu0 %v2734_v47 }
  0xb5   : > { %v2861_v20 = vpop.f32.mrf.mxu2 }
  0xb8   : > { %v2785_v63 = vpop.f32.mrf.mxu1  ;;  %v330_v60 = vpop.f32.mrf.mxu0 }
  0xba   : > { %606 = vmatmul.f32.gmra.mxu2 %v2769_v58 }
  0xbb   : > { %496 = vmatmul.f32.gmra.mxu1 %v2788_v0  ;;  %377 = vmatmul.f32.gmra.mxu0 %v2750_v52 }
  0xbd   : > { %v2869_v23 = vpop.f32.mrf.mxu2 }
  0xc0   : > { %v2804_v5 = vpop.f32.mrf.mxu1  ;;  %v333_v2 = vpop.f32.mrf.mxu0 }
  0xc2   : > { %609 = vmatmul.f32.gmra.mxu2 %v2788_v0 }
  0xc3   : > { %499 = vmatmul.f32.gmra.mxu1 %v2807_v6  ;;  %380 = vmatmul.f32.gmra.mxu0 %v2769_v58  ;;  %v450_v58 = vadd.f32 %v2785_v63, %v2910_v37 }
  0xc5   : > { %v2877_v26 = vpop.f32.mrf.mxu2 }
  0xc8   : > { %v2815_v8 = vpop.f32.mrf.mxu1 }
  0xc9   : > { %v456_v52 = vadd.f32 %v2815_v8, %v2910_v37 }
  0xca   : > { %612 = vmatmul.f32.gmra.mxu2 %v2807_v6 }
  0xcb   : > { %502 = vmatmul.f32.gmra.mxu1 %v2818_v9  ;;  %383 = vmatmul.f32.gmra.mxu0 %v2788_v0  ;;  %v444_v0 = vadd.f32 %v2747_v51, %v2910_v37 }
  0xcd   : > { %v2885_v29 = vpop.f32.mrf.mxu2 }
  0xd0   : > { %v2823_v10 = vpop.f32.mrf.mxu1 }
  0xd1   : > { %v459_v4 = vadd.f32 %v2823_v10, %v2910_v37 }
  0xd2   : > { %615 = vmatmul.f32.gmra.mxu2 %v2818_v9 }
  0xd3   : > { %505 = vmatmul.f32.gmra.mxu1 %v2826_v11  ;;  %386 = vmatmul.f32.gmra.mxu0 %v2807_v6 }
  0xd5   : > { %v2893_v32 = vpop.f32.mrf.mxu2 }
  0xd8   : > { %v2831_v12 = vpop.f32.mrf.mxu1 }
  0xd9   : > { %v462_v47 = vadd.f32 %v2831_v12, %v2910_v37 }
  0xda   : > { %618 = vmatmul.f32.gmra.mxu2 %v2826_v11 }
  0xdb   : > { %508 = vmatmul.f32.gmra.mxu1 %v2834_v13  ;;  %389 = vmatmul.f32.gmra.mxu0 %v2818_v9 }
  0xdd   : > { %v2901_v35 = vpop.f32.mrf.mxu2 }
  0xe0   : > { %v2839_v14 = vpop.f32.mrf.mxu1 }
  0xe1   : > { %v465_v62 = vadd.f32 %v2839_v14, %v2910_v37  ;;  %v336_v14 = vpop.f32.mrf.mxu0 }
  0xe2   : > { %621 = vmatmul.f32.gmra.mxu2 %v2834_v13 }
  0xe3   : > { %511 = vmatmul.f32.gmra.mxu1 %v2842_v15  ;;  %392 = vmatmul.f32.gmra.mxu0 %v2826_v11 }
  0xe5   : > { %v2918_v41 = vpop.f32.mrf.mxu2 }
  0xe8   : > { %v2847_v16 = vpop.f32.mrf.mxu1 }
  0xe9   : > { %v468_v46 = vadd.f32 %v2847_v16, %v2910_v37  ;;  %v453_v16 = vadd.f32 %v2804_v5, %v2910_v37  ;;  %v339_v10 = vpop.f32.mrf.mxu0  ;;  %v2979_v5 = vperm.slane %v2907_v36, 0 }
  0xea   : > { %624 = vmatmul.f32.gmra.mxu2 %v2842_v15 }
  0xeb   : > { %514 = vmatmul.f32.gmra.mxu1 %v2850_v17  ;;  %v2984_v63 = vadd.f32 %v330_v60, %v2979_v5  ;;  %v2992_v6 = vadd.f32 %v333_v2, %v2979_v5  ;;  %395 = vmatmul.f32.gmra.mxu0 %v2834_v13 }
  0xed   : > { %v2927_v49 = vpop.f32.mrf.mxu2 }
  0xf0   : > { %v2855_v18 = vpop.f32.mrf.mxu1 }
  0xf1   : > { %v471_v56 = vadd.f32 %v2855_v18, %v2910_v37 }
  0xf2   : > { %627 = vmatmul.f32.gmra.mxu2 %v2850_v17 }
  0xf3   : > { %517 = vmatmul.f32.gmra.mxu1 %v2858_v19  ;;  %398 = vmatmul.f32.gmra.mxu0 %v2842_v15 }
  0xf5   : > { %v2935_v54 = vpop.f32.mrf.mxu2 }
  0xf8   : > { %v473_v21 = vpop.f32.mrf.mxu1 }
  0xf9   : > { %v474_v55 = vadd.f32 %v473_v21, %v2910_v37  ;;  %v447_v21 = vadd.f32 %v2766_v57, %v2910_v37 }
  0xfa   : > { %630 = vmatmul.f32.gmra.mxu2 %v2858_v19 }
  0xfb   : > { %520 = vmatmul.f32.gmra.mxu1 %v2866_v22  ;;  %401 = vmatmul.f32.gmra.mxu0 %v2850_v17 }
  0xfd   : > { %v2944_v59 = vpop.f32.mrf.mxu2 }
 0x100   : > { %v476_v24 = vpop.f32.mrf.mxu1 }
 0x101   : > { %v477_v53 = vadd.f32 %v476_v24, %v2910_v37 }
 0x102   : > { %633 = vmatmul.f32.gmra.mxu2 %v2866_v22 }
 0x103   : > { %523 = vmatmul.f32.gmra.mxu1 %v2874_v25  ;;  %404 = vmatmul.f32.gmra.mxu0 %v2858_v19 }
 0x105   : > { %v586_v1 = vpop.f32.mrf.mxu2 }
 0x108   : > { %v479_v27 = vpop.f32.mrf.mxu1 }
 0x109   : > { %v480_v44 = vadd.f32 %v479_v27, %v2910_v37  ;;  %v342_v27 = vpop.f32.mrf.mxu0 }
 0x10a   : > { %636 = vmatmul.f32.gmra.mxu2 %v2874_v25 }
 0x10b   : > { %526 = vmatmul.f32.gmra.mxu1 %v2882_v28  ;;  %407 = vmatmul.f32.gmra.mxu0 %v2866_v22 }
 0x10d   : > { %v589_v7 = vpop.f32.mrf.mxu2 }
 0x110   : > { %v482_v30 = vpop.f32.mrf.mxu1 }
 0x111   : > { %v483_v48 = vadd.f32 %v482_v30, %v2910_v37 }
 0x112   : > { %639 = vmatmul.f32.gmra.mxu2 %v2882_v28 }
 0x113   : > { %529 = vmatmul.f32.gmra.mxu1 %v2890_v31  ;;  %410 = vmatmul.f32.gmra.mxu0 %v2874_v25 }
 0x115   : > { %v592_v18 = vpop.f32.mrf.mxu2 }
 0x118   : > { %v485_v33 = vpop.f32.mrf.mxu1 }
 0x119   : > { %v486_v42 = vadd.f32 %v485_v33, %v2910_v37  ;;  %v345_v33 = vpop.f32.mrf.mxu0 }
 0x11a   : > { %642 = vmatmul.f32.gmra.mxu2 %v2890_v31  ;;  %v3052_v17 = vadd.f32 %v345_v33, %v2979_v5 }
 0x11b   : > { %532 = vmatmul.f32.gmra.mxu1 %v2898_v34  ;;  %413 = vmatmul.f32.gmra.mxu0 %v2882_v28 }
 0x11d   : > { %v595_v24 = vpop.f32.mrf.mxu2 }
 0x120   : > { %v488_v38 = vpop.f32.mrf.mxu1 }
 0x121   : > { %v489_v40 = vadd.f32 %v488_v38, %v2910_v37  ;;  %v2998_v38 = vperm.slane %v2907_v36, 2 }
 0x122   : > { %645 = vmatmul.f32.gmra.mxu2 %v2898_v34 }
 0x123   : > { %535 = vmatmul.f32.gmra.mxu1 %v2914_v39  ;;  %652 = vmatpush.xpose.msra.mxu3 %v489_v40  ;;  %v596_v36 = vadd.f32 %v595_v24, %v2998_v38  ;;  %v584_v13 = vadd.f32 %v2944_v59, %v2998_v38  ;;  %v581_v2 = vadd.f32 %v2935_v54, %v2998_v38 }
 0x124   : > { %v3035_v59 = vadd.f32 %v342_v27, %v2979_v5  ;;  %v572_v15 = vadd.f32 %v2901_v35, %v2998_v38  ;;  %v560_v35 = vadd.f32 %v2869_v23, %v2998_v38  ;;  %416 = vmatmul.f32.gmra.mxu0 %v2890_v31 }
 0x125   : > { %v598_v57 = vpop.f32.mrf.mxu2 }
 0x127   : > { %653 = vmatpush.xpose.msra.mxu3 %v486_v42  ;;  %v599_v42 = vadd.f32 %v598_v57, %v2998_v38 }
 0x128   : > { %v2923_v43 = vpop.f32.mrf.mxu1 }
 0x12a   : > { %648 = vmatmul.f32.gmra.mxu2 %v2914_v39 }
 0x12b   : > { %654 = vmatpush.xpose.msra.mxu3 %v483_v48  ;;  %v348_v48 = vpop.f32.mrf.mxu0 }
 0x12c   : > { %419 = vmatmul.f32.gmra.mxu0 %v2898_v34 }
 0x12d   : > { %v601_v40 = vpop.f32.mrf.mxu2 }
 0x12e   : > { %v602_v9 = vadd.f32 %v601_v40, %v2998_v38 }
 0x12f   : > { %655 = vmatpush.xpose.msra.mxu3 %v480_v44  ;;  %v3005_v44 = vadd.f32 %v336_v14, %v2979_v5  ;;  %v569_v14 = vadd.f32 %v2893_v32, %v2998_v38 }
 0x130   : > { %v2931_v50 = vpop.f32.mrf.mxu1  ;;  %1262 = vmatpush.msrb.mxu1 %v602_v9 }
 0x132   : > { %1263 = vmatpush.msrb.mxu1 %v599_v42 }
 0x133   : > { %656 = vmatpush.xpose.msra.mxu3 %v477_v53  ;;  %v351_v60 = vpop.f32.mrf.mxu0 }
 0x134   : > { %1264 = vmatpush.msrb.mxu1 %v596_v36  ;;  %v3068_v24 = vadd.f32 %v351_v60, %v2979_v5  ;;  %422 = vmatmul.f32.gmra.mxu0 %v2914_v39 }
 0x135   : > { %v3012_v11 = vpop.f32.mrf.mxu2 }
 0x137   : > { %657 = vmatpush.xpose.msra.mxu3 %v474_v55  ;;  %v593_v55 = vadd.f32 %v592_v18, %v2998_v38  ;;  %v563_v18 = vadd.f32 %v2877_v26, %v2998_v38 }
 0x138   : > { %v2939_v45 = vpop.f32.mrf.mxu1 }
 0x139   : > { %1265 = vmatpush.msrb.mxu1 %v593_v55 }
 0x13b   : > { %658 = vmatpush.xpose.msra.mxu3 %v471_v56  ;;  %v590_v56 = vadd.f32 %v589_v7, %v2998_v38  ;;  %v575_v7 = vadd.f32 %v2918_v41, %v2998_v38  ;;  %v566_v41 = vadd.f32 %v2885_v29, %v2998_v38  ;;  %v557_v29 = vadd.f32 %v2861_v20, %v2998_v38 }
 0x13d   : > { %1266 = vmatpush.msrb.mxu1 %v590_v56 }
 0x13f   : > { %659 = vmatpush.xpose.msra.mxu3 %v468_v46  ;;  %v587_v46 = vadd.f32 %v586_v1, %v2998_v38  ;;  %v578_v1 = vadd.f32 %v2927_v49, %v2998_v38 }
 0x140   : > { %v2949_v61 = vpop.f32.mrf.mxu1 }
 0x141   : > { %1267 = vmatpush.msrb.mxu1 %v587_v46 }
 0x143   : > { %660 = vmatpush.xpose.msra.mxu3 %v465_v62  ;;  %v3018_v62 = vadd.f32 %v339_v10, %v2979_v5  ;;  %1268 = vmatpush.msrb.mxu1 %v584_v13  ;;  %v3061_v10 = vadd.f32 %v348_v48, %v2979_v5 }
 0x145   : > { %1269 = vmatpush.msrb.mxu1 %v581_v2 }
 0x147   : > { %661 = vmatpush.xpose.msra.mxu3 %v462_v47  ;;  %1270 = vmatpush.msrb.mxu1 %v578_v1 }
 0x148   : > { %v2957_v3 = vpop.f32.mrf.mxu1 }
 0x149   : > { %1271 = vmatpush.msrb.mxu1 %v575_v7 }
 0x14b   : > { %662 = vmatpush.xpose.msra.mxu3 %v459_v4  ;;  %v3027_v4 = vpop.f32.mrf.mxu2  ;;  %1272 = vmatpush.msrb.mxu1 %v572_v15 }
 0x14d   : > { %1273 = vmatpush.msrb.mxu1 %v569_v14 }
 0x14f   : > { %663 = vmatpush.xpose.msra.mxu3 %v456_v52  ;;  %v354_v52 = vpop.f32.mrf.mxu0  ;;  %1274 = vmatpush.msrb.mxu1 %v566_v41 }
 0x150   : > { %v2965_v12 = vpop.f32.mrf.mxu1  ;;  %v3075_v57 = vadd.f32 %v354_v52, %v2979_v5 }
 0x151   : > { %1275 = vmatpush.msrb.mxu1 %v563_v18  ;;  %v507_v14 = vadd.f32 %v2965_v12, %v2910_v37  ;;  %v498_v12 = vadd.f32 %v2939_v45, %v2910_v37 }
 0x153   : > { %664 = vmatpush.xpose.msra.mxu3 %v453_v16  ;;  %v3040_v49 = vpop.f32.mrf.mxu2  ;;  %1276 = vmatpush.msrb.mxu1 %v560_v35 }
 0x155   : > { %1277 = vmatpush.msrb.mxu1 %v557_v29 }
 0x157   : > { %665 = vmatpush.xpose.msra.mxu3 %v450_v58  ;;  %v357_v16 = vpop.f32.mrf.mxu0 }
 0x158   : > { %v2973_v8 = vpop.f32.mrf.mxu1  ;;  %v3084_v42 = vadd.f32 %v357_v16, %v2979_v5 }
 0x159   : > { %v510_v39 = vadd.f32 %v2973_v8, %v2910_v37  ;;  %v501_v8 = vadd.f32 %v2949_v61, %v2910_v37 }
 0x15b   : > { %666 = vmatpush.xpose.msra.mxu3 %v447_v21  ;;  %v3055_v32 = vpop.f32.mrf.mxu2 }
 0x15f   : > { %667 = vmatpush.xpose.msra.mxu3 %v444_v0  ;;  %v360_v26 = vpop.f32.mrf.mxu0 }
 0x160   : > { %v2987_v30 = vpop.f32.mrf.mxu1  ;;  %v3093_v56 = vadd.f32 %v360_v26, %v2979_v5  ;;  %v492_v26 = vadd.f32 %v2923_v43, %v2910_v37 }
 0x162   : > { %668 = vmatmul.f32.vlgmr.msra.gmra.mxu3 %v2984_v63 }
 0x163   : > { %v3064_v21 = vpop.f32.mrf.mxu2 }
 0x167   : > { %v363_v19 = vpop.f32.mrf.mxu0 }
 0x168   : > { %v2995_v51 = vpop.f32.mrf.mxu1  ;;  %v3103_v2 = vadd.f32 %v363_v19, %v2979_v5 }
 0x169   : > { %v516_v34 = vadd.f32 %v2995_v51, %v2910_v37 }
 0x16a   : > { %671 = vmatmul.f32.gmra.mxu3 %v2992_v6 }
 0x16b   : > { %v3071_v20 = vpop.f32.mrf.mxu2 }
 0x16f   : > { %v366_v27 = vpop.f32.mrf.mxu0 }
 0x170   : > { %v3007_v53 = vpop.f32.mrf.mxu1 }
 0x171   : > { %v519_v1 = vadd.f32 %v3007_v53, %v2910_v37 }
 0x172   : > { %674 = vmatmul.f32.gmra.mxu3 %v3005_v44 }
 0x173   : > { %v3079_v40 = vpop.f32.mrf.mxu2 }
 0x177   : > { %v369_v9 = vpop.f32.mrf.mxu0 }
 0x178   : > { %v3020_v47 = vpop.f32.mrf.mxu1  ;;  %v3120_v53 = vadd.f32 %v369_v9, %v2979_v5 }
 0x179   : > { %v522_v31 = vadd.f32 %v3020_v47, %v2910_v37  ;;  %v3112_v47 = vadd.f32 %v366_v27, %v2979_v5 }
 0x17a   : > { %677 = vmatmul.f32.gmra.mxu3 %v3018_v62 }
 0x17b   : > { %v3088_v36 = vpop.f32.mrf.mxu2 }
 0x17f   : > { %v372_v55 = vpop.f32.mrf.mxu0 }
 0x180   : > { %v524_v54 = vpop.f32.mrf.mxu1  ;;  %v3128_v16 = vadd.f32 %v372_v55, %v2979_v5  ;;  %v626_v55 = vadd.f32 %v3088_v36, %v2998_v38  ;;  %v617_v36 = vadd.f32 %v3064_v21, %v2998_v38 }
 0x181   : > { %v525_v46 = vadd.f32 %v524_v54, %v2910_v37  ;;  %v513_v54 = vadd.f32 %v2987_v30, %v2910_v37  ;;  %v504_v30 = vadd.f32 %v2957_v3, %v2910_v37  ;;  %v495_v3 = vadd.f32 %v2931_v50, %v2910_v37 }
 0x182   : > { %680 = vmatmul.f32.gmra.mxu3 %v3035_v59 }
 0x183   : > { %v3097_v60 = vpop.f32.mrf.mxu2 }
 0x187   : > { %v375_v13 = vpop.f32.mrf.mxu0 }
 0x188   : > { %v527_v58 = vpop.f32.mrf.mxu1 }
 0x189   : > { %v528_v28 = vadd.f32 %v527_v58, %v2910_v37  ;;  %v3136_v58 = vadd.f32 %v375_v13, %v2979_v5  ;;  %v608_v13 = vadd.f32 %v3027_v4, %v2998_v38 }
 0x18a   : > { %683 = vmatmul.f32.gmra.mxu3 %v3052_v17 }
 0x18b   : > { %v631_v7 = vpop.f32.mrf.mxu2 }
 0x18c   : > { %v632_v9 = vadd.f32 %v631_v7, %v2998_v38 }
 0x18f   : > { %v378_v52 = vpop.f32.mrf.mxu0 }
 0x190   : > { %v530_v23 = vpop.f32.mrf.mxu1 }
 0x191   : > { %v531_v48 = vadd.f32 %v530_v23, %v2910_v37  ;;  %v3144_v23 = vadd.f32 %v378_v52, %v2979_v5 }
 0x192   : > { %686 = vmatmul.f32.gmra.mxu3 %v3061_v10 }
 0x193   : > { %v634_v15 = vpop.f32.mrf.mxu2 }
 0x197   : > { %v381_v51 = vpop.f32.mrf.mxu0 }
 0x198   : > { %v533_v0 = vpop.f32.mrf.mxu1  ;;  %v3149_v50 = vadd.f32 %v381_v51, %v2979_v5 }
 0x199   : > { %v534_v25 = vadd.f32 %v533_v0, %v2910_v37 }
 0x19a   : > { %689 = vmatmul.f32.gmra.mxu3 %v3068_v24 }
 0x19b   : > { %v637_v41 = vpop.f32.mrf.mxu2 }
 0x19f   : > { %v384_v18 = vpop.f32.mrf.mxu0 }
 0x1a0   : > { %v536_v22 = vpop.f32.mrf.mxu1 }
 0x1a1   : > { %v537_v33 = vadd.f32 %v536_v22, %v2910_v37 }
 0x1a2   : > { %692 = vmatmul.f32.gmra.mxu3 %v3075_v57 }
 0x1a3   : > { %765 = vmatpush.xpose.msrb.mxu0 %v537_v33  ;;  %v640_v35 = vpop.f32.mrf.mxu2  ;;  %v638_v33 = vadd.f32 %v637_v41, %v2998_v38 }
 0x1a7   : > { %766 = vmatpush.xpose.msrb.mxu0 %v534_v25  ;;  %v387_v61 = vpop.f32.mrf.mxu0  ;;  %v635_v25 = vadd.f32 %v634_v15, %v2998_v38 }
 0x1aa   : > { %695 = vmatmul.f32.gmra.mxu3 %v3084_v42 }
 0x1ab   : > { %767 = vmatpush.xpose.msrb.mxu0 %v531_v48  ;;  %v643_v29 = vpop.f32.mrf.mxu2  ;;  %v3166_v48 = vadd.f32 %v387_v61, %v2979_v5 }
 0x1ac   : > { %v644_v43 = vadd.f32 %v643_v29, %v2998_v38 }
 0x1af   : > { %768 = vmatpush.xpose.msrb.mxu0 %v528_v28  ;;  %v390_v19 = vpop.f32.mrf.mxu0 }
 0x1b2   : > { %698 = vmatmul.f32.gmra.mxu3 %v3093_v56 }
 0x1b3   : > { %769 = vmatpush.xpose.msrb.mxu0 %v525_v46  ;;  %v646_v45 = vpop.f32.mrf.mxu2  ;;  %v623_v46 = vadd.f32 %v3079_v40, %v2998_v38 }
 0x1b4   : > { %v647_v37 = vadd.f32 %v646_v45, %v2998_v38 }
 0x1b7   : > { %770 = vmatpush.xpose.msrb.mxu0 %v522_v31  ;;  %v393_v22 = vpop.f32.mrf.mxu0  ;;  %v620_v31 = vadd.f32 %v3071_v20, %v2998_v38  ;;  %v611_v20 = vadd.f32 %v3040_v49, %v2998_v38 }
 0x1ba   : > { %701 = vmatmul.f32.gmra.mxu3 %v3103_v2 }
 0x1bb   : > { %771 = vmatpush.xpose.msrb.mxu0 %v519_v1  ;;  %v649_v0 = vpop.f32.mrf.mxu2 }
 0x1bc   : > { %v650_v27 = vadd.f32 %v649_v0, %v2998_v38 }
 0x1be   : > { %1375 = vmatpush.msrb.mxu2 %v650_v27 }
 0x1bf   : > { %772 = vmatpush.xpose.msrb.mxu0 %v516_v34  ;;  %v396_v28 = vpop.f32.mrf.mxu0 }
 0x1c0   : > { %1376 = vmatpush.msrb.mxu2 %v647_v37  ;;  %v3199_v49 = vadd.f32 %v396_v28, %v2979_v5 }
 0x1c2   : > { %704 = vmatmul.f32.gmra.mxu3 %v3112_v47  ;;  %1377 = vmatpush.msrb.mxu2 %v644_v43 }
 0x1c3   : > { %773 = vmatpush.xpose.msrb.mxu0 %v513_v54 }
 0x1c7   : > { %774 = vmatpush.xpose.msrb.mxu0 %v510_v39  ;;  %v399_v40 = vpop.f32.mrf.mxu0 }
 0x1c8   : > { %v3206_v1 = vadd.f32 %v399_v40, %v2979_v5 }
 0x1ca   : > { %707 = vmatmul.f32.gmra.mxu3 %v3120_v53 }
 0x1cb   : > { %775 = vmatpush.xpose.msrb.mxu0 %v507_v14 }
 0x1cf   : > { %776 = vmatpush.xpose.msrb.mxu0 %v504_v30  ;;  %v402_v21 = vpop.f32.mrf.mxu0 }
 0x1d2   : > { %710 = vmatmul.f32.gmra.mxu3 %v3128_v16 }
 0x1d3   : > { %777 = vmatpush.xpose.msrb.mxu0 %v501_v8 }
 0x1d7   : > { %778 = vmatpush.xpose.msrb.mxu0 %v498_v12 }
 0x1da   : > { %713 = vmatmul.f32.gmra.mxu3 %v3136_v58 }
 0x1db   : > { %779 = vmatpush.xpose.msrb.mxu0 %v495_v3 }
 0x1df   : > { %780 = vmatpush.xpose.msrb.mxu0 %v492_v26 }
 0x1e2   : > { %781 = vmatmul.f32.vlgmr.msrb.gmra.mxu0 %v2984_v63  ;;  %716 = vmatmul.f32.gmra.mxu3 %v3144_v23  ;;  %v3157_v63 = vadd.f32 %v384_v18, %v2979_v5 }
 0x1e5   : > { %v3203_v4 = vpop.f32.mrf.mxu3 }
 0x1ea   : > { %784 = vmatmul.f32.gmra.mxu0 %v2992_v6  ;;  %719 = vmatmul.f32.gmra.mxu3 %v3149_v50  ;;  %v641_v6 = vadd.f32 %v640_v35, %v2998_v38 }
 0x1ec   : > { %1378 = vmatpush.msrb.mxu2 %v641_v6 }
 0x1ee   : > { %1379 = vmatpush.msrb.mxu2 %v638_v33 }
 0x1f0   : > { %1380 = vmatpush.msrb.mxu2 %v635_v25 }
 0x1f2   : > { %787 = vmatmul.f32.gmra.mxu0 %v3005_v44  ;;  %722 = vmatmul.f32.gmra.mxu3 %v3157_v63  ;;  %v629_v44 = vadd.f32 %v3097_v60, %v2998_v38  ;;  %v614_v60 = vadd.f32 %v3055_v32, %v2998_v38  ;;  %v605_v32 = vadd.f32 %v3012_v11, %v2998_v38  ;;  %v3213_v11 = vpop.f32.mrf.mxu3 }
 0x1f3   : > { %1381 = vmatpush.msrb.mxu2 %v632_v9  ;;  %v3211_v38 = vadd.f32 %v402_v21, %v2979_v5 }
 0x1f5   : > { %1382 = vmatpush.msrb.mxu2 %v629_v44 }
 0x1f7   : > { %1383 = vmatpush.msrb.mxu2 %v626_v55 }
 0x1f9   : > { %1384 = vmatpush.msrb.mxu2 %v623_v46 }
 0x1fa   : > { %790 = vmatmul.f32.gmra.mxu0 %v3018_v62  ;;  %725 = vmatmul.f32.gmra.mxu3 %v3166_v48  ;;  %v3179_v62 = vadd.f32 %v390_v19, %v2979_v5  ;;  %v3220_v34 = vpop.f32.mrf.mxu3 }
 0x1fb   : > { %1385 = vmatpush.msrb.mxu2 %v620_v31 }
 0x1fd   : > { %1386 = vmatpush.msrb.mxu2 %v617_v36 }
 0x1ff   : > { %1387 = vmatpush.msrb.mxu2 %v614_v60 }
 0x201   : > { %1388 = vmatpush.msrb.mxu2 %v611_v20 }
 0x202   : > { %793 = vmatmul.f32.gmra.mxu0 %v3035_v59  ;;  %728 = vmatmul.f32.gmra.mxu3 %v3179_v62  ;;  %v3192_v59 = vadd.f32 %v393_v22, %v2979_v5  ;;  %v3228_v54 = vpop.f32.mrf.mxu3 }
 0x203   : > { %1389 = vmatpush.msrb.mxu2 %v608_v13 }
 0x205   : > { %1390 = vmatpush.msrb.mxu2 %v605_v32 }
 0x20a   : > { %796 = vmatmul.f32.gmra.mxu0 %v3052_v17  ;;  %731 = vmatmul.f32.gmra.mxu3 %v3192_v59  ;;  %v405_v17 = vpop.f32.mrf.mxu0 }
 0x20b   : > { %v3218_v7 = vadd.f32 %v405_v17, %v2979_v5 }
 0x212   : > { %799 = vmatmul.f32.gmra.mxu0 %v3061_v10  ;;  %734 = vmatmul.f32.gmra.mxu3 %v3199_v49  ;;  %v408_v10 = vpop.f32.mrf.mxu0 }
 0x213   : > { %v3225_v52 = vadd.f32 %v408_v10, %v2979_v5 }
 0x21a   : > { %802 = vmatmul.f32.gmra.mxu0 %v3068_v24  ;;  %737 = vmatmul.f32.gmra.mxu3 %v3206_v1  ;;  %v411_v24 = vpop.f32.mrf.mxu0 }
 0x21b   : > { %v3232_v15 = vadd.f32 %v411_v24, %v2979_v5 }
 0x222   : > { %805 = vmatmul.f32.gmra.mxu0 %v3075_v57  ;;  %740 = vmatmul.f32.gmra.mxu3 %v3211_v38  ;;  %v414_v57 = vpop.f32.mrf.mxu0 }
 0x223   : > { %v3239_v39 = vadd.f32 %v414_v57, %v2979_v5 }
 0x22a   : > { %808 = vmatmul.f32.gmra.mxu0 %v3084_v42  ;;  %743 = vmatmul.f32.gmra.mxu3 %v3218_v7  ;;  %v3236_v42 = vpop.f32.mrf.mxu3  ;;  %v417_v51 = vpop.f32.mrf.mxu0 }
 0x232   : > { %811 = vmatmul.f32.gmra.mxu0 %v3093_v56  ;;  %746 = vmatmul.f32.gmra.mxu3 %v3225_v52  ;;  %v3244_v56 = vadd.f32 %v417_v51, %v2979_v5  ;;  %v3246_v14 = vpop.f32.mrf.mxu3 }
 0x23a   : > { %814 = vmatmul.f32.gmra.mxu0 %v3103_v2  ;;  %749 = vmatmul.f32.gmra.mxu3 %v3232_v15  ;;  %v420_v2 = vpop.f32.mrf.mxu0  ;;  %v3253_v30 = vpop.f32.mrf.mxu3 }
 0x23b   : > { %v3251_v41 = vadd.f32 %v420_v2, %v2979_v5 }
 0x242   : > { %817 = vmatmul.f32.gmra.mxu0 %v3112_v47  ;;  %752 = vmatmul.f32.gmra.mxu3 %v3239_v39  ;;  %v423_v47 = vpop.f32.mrf.mxu0  ;;  %v3261_v18 = vpop.f32.mrf.mxu3 }
 0x243   : > { %v3258_v8 = vadd.f32 %v423_v47, %v2979_v5 }
 0x24a   : > { %820 = vmatmul.f32.gmra.mxu0 %v3120_v53  ;;  %755 = vmatmul.f32.gmra.mxu3 %v3244_v56  ;;  %v3278_v3 = vpop.f32.mrf.mxu3 }
 0x252   : > { %823 = vmatmul.f32.gmra.mxu0 %v3128_v16  ;;  %758 = vmatmul.f32.gmra.mxu3 %v3251_v41  ;;  %v3286_v26 = vpop.f32.mrf.mxu3 }
 0x25a   : > { %826 = vmatmul.f32.gmra.mxu0 %v3136_v58  ;;  %761 = vmatmul.f32.gmra.mxu3 %v3258_v8  ;;  %v3293_v19 = vpop.f32.mrf.mxu3 }
 0x25f   : > { %v3264_v53 = vpop.f32.mrf.mxu0 }
 0x260   : > { %v878_v35 = vmax.f32 %v3203_v4, %v3264_v53 }
 0x262   : > { %829 = vmatmul.f32.gmra.mxu0 %v3144_v23  ;;  %879 = vmax.xlane.f32.xlu0 %v878_v35  ;;  %v3302_v37 = vpop.f32.mrf.mxu3 }
 0x267   : > { %v3269_v16 = vpop.f32.mrf.mxu0 }
 0x268   : > { %v881_v5 = vmax.f32 %v3213_v11, %v3269_v16 }
 0x26a   : > { %832 = vmatmul.f32.gmra.mxu0 %v3149_v50  ;;  %882 = vmax.xlane.f32.xlu0 %v881_v5  ;;  %v3311_v6 = vpop.f32.mrf.mxu3 }
 0x26f   : > { %v3274_v12 = vpop.f32.mrf.mxu0 }
 0x270   : > { %v884_v58 = vmax.f32 %v3220_v34, %v3274_v12 }
 0x272   : > { %835 = vmatmul.f32.gmra.mxu0 %v3157_v63  ;;  %885 = vmax.xlane.f32.xlu1 %v884_v58  ;;  %v3319_v9 = vpop.f32.mrf.mxu3 }
 0x277   : > { %v3281_v29 = vpop.f32.mrf.mxu0 }
 0x278   : > { %v887_v61 = vmax.f32 %v3228_v54, %v3281_v29 }
 0x27a   : > { %838 = vmatmul.f32.gmra.mxu0 %v3166_v48  ;;  %888 = vmax.xlane.f32.xlu1 %v887_v61  ;;  %v3326_v44 = vpop.f32.mrf.mxu3 }
 0x27f   : > { %v3288_v23 = vpop.f32.mrf.mxu0 }
 0x280   : > { %v890_v45 = vmax.f32 %v3236_v42, %v3288_v23 }
 0x282   : > { %841 = vmatmul.f32.gmra.mxu0 %v3179_v62  ;;  %891 = vmax.xlane.f32.xlu2 %v890_v45  ;;  %v3335_v62 = vpop.f32.mrf.mxu3 }
 0x287   : > { %v3295_v50 = vpop.f32.mrf.mxu0 }
 0x288   : > { %v893_v0 = vmax.f32 %v3246_v14, %v3295_v50 }
 0x28a   : > { %844 = vmatmul.f32.gmra.mxu0 %v3192_v59  ;;  %894 = vmax.xlane.f32.xlu2 %v893_v0  ;;  %v3344_v20 = vpop.f32.mrf.mxu3 }
 0x28f   : > { %v3300_v27 = vpop.f32.mrf.mxu0 }
 0x290   : > { %v896_v43 = vmax.f32 %v3253_v30, %v3300_v27 }
 0x292   : > { %847 = vmatmul.f32.gmra.mxu0 %v3199_v49  ;;  %897 = vmax.xlane.f32.xlu0 %v896_v43  ;;  %v3352_v32 = vpop.f32.mrf.mxu3 }
 0x297   : > { %v3307_v63 = vpop.f32.mrf.mxu0 }
 0x298   : > { %v899_v22 = vmax.f32 %v3261_v18, %v3307_v63 }
 0x29a   : > { %850 = vmatmul.f32.gmra.mxu0 %v3206_v1  ;;  %900 = vmax.xlane.f32.xlu1 %v899_v22  ;;  %v3359_v17 = vpop.f32.mrf.mxu3 }
 0x29f   : > { %v3314_v33 = vpop.f32.mrf.mxu0 }
 0x2a0   : > { %v902_v25 = vmax.f32 %v3278_v3, %v3314_v33 }
 0x2a2   : > { %853 = vmatmul.f32.gmra.mxu0 %v3211_v38  ;;  %903 = vmax.xlane.f32.xlu2 %v902_v25 }
 0x2a7   : > { %v3321_v48 = vpop.f32.mrf.mxu0 }
 0x2a8   : > { %v905_v28 = vmax.f32 %v3286_v26, %v3321_v48 }
 0x2aa   : > { %856 = vmatmul.f32.gmra.mxu0 %v3218_v7  ;;  %906 = vmax.xlane.f32.xlu0 %v905_v28 }
 0x2af   : > { %v3328_v55 = vpop.f32.mrf.mxu0 }
 0x2b0   : > { %v908_v46 = vmax.f32 %v3293_v19, %v3328_v55 }
 0x2b2   : > { %859 = vmatmul.f32.gmra.mxu0 %v3225_v52  ;;  %909 = vmax.xlane.f32.xlu1 %v908_v46 }
 0x2b7   : > { %v3333_v31 = vpop.f32.mrf.mxu0 }
 0x2b8   : > { %v911_v36 = vmax.f32 %v3302_v37, %v3333_v31 }
 0x2ba   : > { %862 = vmatmul.f32.gmra.mxu0 %v3232_v15  ;;  %912 = vmax.xlane.f32.xlu2 %v911_v36 }
 0x2bf   : > { %v3340_v60 = vpop.f32.mrf.mxu0 }
 0x2c0   : > { %v914_v40 = vmax.f32 %v3311_v6, %v3340_v60 }
 0x2c2   : > { %865 = vmatmul.f32.gmra.mxu0 %v3239_v39  ;;  %915 = vmax.xlane.f32.xlu0 %v914_v40 }
 0x2c7   : > { %v3347_v13 = vpop.f32.mrf.mxu0 }
 0x2c8   : > { %v917_v59 = vmax.f32 %v3319_v9, %v3347_v13 }
 0x2ca   : > { %868 = vmatmul.f32.gmra.mxu0 %v3244_v56  ;;  %918 = vmax.xlane.f32.xlu1 %v917_v59  ;;  %v3372_v56 = vpop.f32.mrf.mxu3 }
 0x2cf   : > { %v3354_v21 = vpop.f32.mrf.mxu0 }
 0x2d0   : > { %v920_v49 = vmax.f32 %v3326_v44, %v3354_v21 }
 0x2d2   : > { %871 = vmatmul.f32.gmra.mxu0 %v3251_v41  ;;  %921 = vmax.xlane.f32.xlu2 %v920_v49  ;;  %v3384_v25 = vpop.f32.mrf.mxu3 }
 0x2d5   : > { %v880_v1 = vpop.xlane.xlu0 %879 }
 0x2d6   : > { %v974_v38 = vsub.f32 %v3203_v4, %v880_v1  ;;  %v975_v10 = vsub.f32 %v3264_v53, %v880_v1 }
 0x2d7   : > { %v3363_v7 = vpop.f32.mrf.mxu0 }
 0x2d8   : > { %v1038_v24 = vmul.f32 1.442695, %v974_v38  ;;  %v1040_v52 = vmul.f32 1.442695, %v975_v10  ;;  %v923_v57 = vmax.f32 %v3335_v62, %v3363_v7 }
 0x2da   : > { %2290 = vpow2.f32 %v1038_v24  ;;  %874 = vmatmul.f32.gmra.mxu0 %v3258_v8  ;;  %924 = vmax.xlane.f32.xlu0 %v923_v57  ;;  %v3396_v24 = vpop.f32.mrf.mxu3 }
 0x2db   : > { %2292 = vpow2.f32 %v1040_v52 }
 0x2dd   : > { %v883_v15 = vpop.xlane.xlu0 %882 }
 0x2de   : > { %v976_v39 = vsub.f32 %v3213_v11, %v883_v15  ;;  %v977_v51 = vsub.f32 %v3269_v16, %v883_v15 }
 0x2df   : > { %v3370_v4 = vpop.f32.mrf.mxu0 }
 0x2e0   : > { %v2291_v2 = vpop.eup %2290  ;;  %v1042_v41 = vmul.f32 1.442695, %v976_v39  ;;  %v1044_v47 = vmul.f32 1.442695, %v977_v51  ;;  %v926_v53 = vmax.f32 %v3344_v20, %v3370_v4 }
 0x2e1   : > { %v2293_v35 = vpop.eup %2292  ;;  %1278 = vmatmul.f32.vlgmr.msrb.gmra.mxu1 %v2291_v2 }
 0x2e2   : > { %2294 = vpow2.f32 %v1042_v41  ;;  %1391 = vmatmul.f32.vlgmr.msrb.gmra.mxu2 %v2293_v35  ;;  %927 = vmax.xlane.f32.xlu1 %v926_v53  ;;  %v3376_v8 = vadd.f32 %v2293_v35, %v2291_v2 }
 0x2e3   : > { %2296 = vpow2.f32 %v1044_v47 }
 0x2e5   : > { %v886_v11 = vpop.xlane.xlu1 %885 }
 0x2e6   : > { %v978_v16 = vsub.f32 %v3220_v34, %v886_v11  ;;  %v979_v5 = vsub.f32 %v3274_v12, %v886_v11 }
 0x2e7   : > { %v3380_v58 = vpop.f32.mrf.mxu0 }
 0x2e8   : > { %v2295_v61 = vpop.eup %2294  ;;  %v1046_v45 = vmul.f32 1.442695, %v978_v16  ;;  %v1048_v0 = vmul.f32 1.442695, %v979_v5  ;;  %v929_v43 = vmax.f32 %v3352_v32, %v3380_v58 }
 0x2e9   : > { %v2297_v22 = vpop.eup %2296  ;;  %1281 = vmatmul.f32.gmra.mxu1 %v2295_v61 }
 0x2ea   : > { %2298 = vpow2.f32 %v1046_v45  ;;  %1394 = vmatmul.f32.gmra.mxu2 %v2297_v22  ;;  %930 = vmax.xlane.f32.xlu2 %v929_v43  ;;  %v3386_v28 = vadd.f32 %v2297_v22, %v2295_v61 }
 0x2eb   : > { %2300 = vpow2.f32 %v1048_v0 }
 0x2ed   : > { %v889_v34 = vpop.xlane.xlu1 %888 }
 0x2ee   : > { %v980_v12 = vsub.f32 %v3228_v54, %v889_v34  ;;  %v981_v46 = vsub.f32 %v3281_v29, %v889_v34 }
 0x2ef   : > { %v3390_v36 = vpop.f32.mrf.mxu0 }
 0x2f0   : > { %v2299_v40 = vpop.eup %2298  ;;  %v1050_v59 = vmul.f32 1.442695, %v980_v12  ;;  %v1052_v49 = vmul.f32 1.442695, %v981_v46  ;;  %v932_v1 = vmax.f32 %v3359_v17, %v3390_v36 }
 0x2f1   : > { %v2301_v38 = vpop.eup %2300  ;;  %1284 = vmatmul.f32.gmra.mxu1 %v2299_v40 }
 0x2f2   : > { %2302 = vpow2.f32 %v1050_v59  ;;  %1397 = vmatmul.f32.gmra.mxu2 %v2301_v38  ;;  %933 = vmax.xlane.f32.xlu0 %v932_v1  ;;  %v3394_v10 = vadd.f32 %v2301_v38, %v2299_v40 }
 0x2f3   : > { %2304 = vpow2.f32 %v1052_v49 }
 0x2f5   : > { %v892_v54 = vpop.xlane.xlu2 %891 }
 0x2f6   : > { %v982_v29 = vsub.f32 %v3236_v42, %v892_v54  ;;  %v983_v52 = vsub.f32 %v3288_v23, %v892_v54  ;;  %v3404_v42 = vpop.f32.mrf.mxu3 }
 0x2f7   : > { %v3400_v57 = vpop.f32.mrf.mxu0 }
 0x2f8   : > { %v2303_v15 = vpop.eup %2302  ;;  %v1054_v39 = vmul.f32 1.442695, %v982_v29  ;;  %v1056_v51 = vmul.f32 1.442695, %v983_v52  ;;  %v935_v2 = vmax.f32 %v3372_v56, %v3400_v57 }
 0x2f9   : > { %v2305_v41 = vpop.eup %2304  ;;  %1287 = vmatmul.f32.gmra.mxu1 %v2303_v15 }
 0x2fa   : > { %2306 = vpow2.f32 %v1054_v39  ;;  %1400 = vmatmul.f32.gmra.mxu2 %v2305_v41  ;;  %936 = vmax.xlane.f32.xlu1 %v935_v2  ;;  %v1175_v47 = vadd.f32 %v2305_v41, %v2303_v15 }
 0x2fb   : > { %2308 = vpow2.f32 %v1056_v51 }
 0x2fc   : > { %1176 = vadd.xlane.f32.xlu2 %v1175_v47 }
 0x2fd   : > { %v895_v53 = vpop.xlane.xlu2 %894 }
 0x2fe   : > { %v984_v23 = vsub.f32 %v3246_v14, %v895_v53  ;;  %v985_v35 = vsub.f32 %v3295_v50, %v895_v53  ;;  %v3416_v12 = vpop.f32.mrf.mxu3 }
 0x2ff   : > { %v3408_v11 = vpop.f32.mrf.mxu0 }
 0x300   : > { %v2307_v16 = vpop.eup %2306  ;;  %v1058_v5 = vmul.f32 1.442695, %v984_v23  ;;  %v1060_v61 = vmul.f32 1.442695, %v985_v35  ;;  %v938_v45 = vmax.f32 %v3384_v25, %v3408_v11 }
 0x301   : > { %v2309_v0 = vpop.eup %2308  ;;  %1290 = vmatmul.f32.gmra.mxu1 %v2307_v16 }
 0x302   : > { %2310 = vpow2.f32 %v1058_v5  ;;  %1403 = vmatmul.f32.gmra.mxu2 %v2309_v0  ;;  %939 = vmax.xlane.f32.xlu0 %v938_v45  ;;  %v1178_v43 = vadd.f32 %v2309_v0, %v2307_v16 }
 0x303   : > { %2312 = vpow2.f32 %v1060_v61 }
 0x304   : > { %1179 = vadd.xlane.f32.xlu1 %v1178_v43 }
 0x305   : > { %v898_v22 = vpop.xlane.xlu0 %897 }
 0x306   : > { %v986_v14 = vsub.f32 %v3253_v30, %v898_v22  ;;  %v987_v50 = vsub.f32 %v3300_v27, %v898_v22  ;;  %v3426_v41 = vpop.f32.mrf.mxu3 }
 0x307   : > { %v3414_v34 = vpop.f32.mrf.mxu0 }
 0x308   : > { %v2311_v46 = vpop.eup %2310  ;;  %v1062_v40 = vmul.f32 1.442695, %v986_v14  ;;  %v1064_v59 = vmul.f32 1.442695, %v987_v50  ;;  %v941_v49 = vmax.f32 %v3396_v24, %v3414_v34 }
 0x309   : > { %v2313_v1 = vpop.eup %2312  ;;  %1293 = vmatmul.f32.gmra.mxu1 %v2311_v46 }
 0x30a   : > { %2314 = vpow2.f32 %v1062_v40  ;;  %1406 = vmatmul.f32.gmra.mxu2 %v2313_v1  ;;  %942 = vmax.xlane.f32.xlu2 %v941_v49  ;;  %v1181_v38 = vadd.f32 %v2313_v1, %v2311_v46 }
 0x30b   : > { %2316 = vpow2.f32 %v1064_v59 }
 0x30c   : > { %1182 = vadd.xlane.f32.xlu0 %v1181_v38 }
 0x30d   : > { %v901_v30 = vpop.xlane.xlu1 %900 }
 0x30e   : > { %v988_v27 = vsub.f32 %v3261_v18, %v901_v30  ;;  %v989_v54 = vsub.f32 %v3307_v63, %v901_v30  ;;  %v3434_v43 = vpop.f32.mrf.mxu3 }
 0x30f   : > { %v3422_v29 = vpop.f32.mrf.mxu0 }
 0x310   : > { %v2315_v52 = vpop.eup %2314  ;;  %v1066_v15 = vmul.f32 1.442695, %v988_v27  ;;  %v1068_v39 = vmul.f32 1.442695, %v989_v54  ;;  %v944_v51 = vmax.f32 %v3404_v42, %v3422_v29 }
 0x311   : > { %v2317_v2 = vpop.eup %2316  ;;  %1296 = vmatmul.f32.gmra.mxu1 %v2315_v52 }
 0x312   : > { %2318 = vpow2.f32 %v1066_v15  ;;  %1409 = vmatmul.f32.gmra.mxu2 %v2317_v2  ;;  %945 = vmax.xlane.f32.xlu1 %v944_v51  ;;  %v1184_v47 = vadd.f32 %v2317_v2, %v2315_v52 }
 0x313   : > { %2320 = vpow2.f32 %v1068_v39 }
 0x314   : > { %1185 = vadd.xlane.f32.xlu2 %v1184_v47 }
 0x315   : > { %v904_v18 = vpop.xlane.xlu2 %903 }
 0x316   : > { %v990_v63 = vsub.f32 %v3278_v3, %v904_v18  ;;  %v991_v53 = vsub.f32 %v3314_v33, %v904_v18  ;;  %v3445_v38 = vpop.f32.mrf.mxu3 }
 0x317   : > { %v3430_v23 = vpop.f32.mrf.mxu0 }
 0x318   : > { %v2319_v35 = vpop.eup %2318  ;;  %v1070_v16 = vmul.f32 1.442695, %v990_v63  ;;  %v1072_v5 = vmul.f32 1.442695, %v991_v53  ;;  %v947_v61 = vmax.f32 %v3416_v12, %v3430_v23 }
 0x319   : > { %v2321_v45 = vpop.eup %2320  ;;  %1299 = vmatmul.f32.gmra.mxu1 %v2319_v35 }
 0x31a   : > { %2322 = vpow2.f32 %v1070_v16  ;;  %1412 = vmatmul.f32.gmra.mxu2 %v2321_v45  ;;  %948 = vmax.xlane.f32.xlu0 %v947_v61  ;;  %v1187_v0 = vadd.f32 %v2321_v45, %v2319_v35 }
 0x31b   : > { %2324 = vpow2.f32 %v1072_v5 }
 0x31c   : > { %1188 = vadd.xlane.f32.xlu1 %v1187_v0 }
 0x31d   : > { %v907_v3 = vpop.xlane.xlu0 %906 }
 0x31e   : > { %v992_v33 = vsub.f32 %v3286_v26, %v907_v3  ;;  %v993_v22 = vsub.f32 %v3321_v48, %v907_v3  ;;  %v1983_v26 = vld [vmem:[%s3833_s3 + $0x78] sm:$0xff]  ;;  %v3457_v53 = vpop.f32.mrf.mxu3 }
 0x31f   : > { %v3438_v14 = vpop.f32.mrf.mxu0  ;;  %2235 = vmatpush.msrb.mxu3 %v1983_v26  ;;  %2234 = vmatpush.msra.mxu2 %v1983_v26 }
 0x320   : > { %v2323_v50 = vpop.eup %2322  ;;  %v1074_v46 = vmul.f32 1.442695, %v992_v33  ;;  %v1076_v40 = vmul.f32 1.442695, %v993_v22  ;;  %v950_v59 = vmax.f32 %v3426_v41, %v3438_v14  ;;  %1988 = vmatpush.msra.mxu0 %v1983_v26  ;;  %2233 = vmatpush.msra.mxu1 %v1983_v26 }
 0x321   : > { %v2325_v49 = vpop.eup %2324  ;;  %1302 = vmatmul.f32.gmra.mxu1 %v2323_v50 }
 0x322   : > { %2326 = vpow2.f32 %v1074_v46  ;;  %1415 = vmatmul.f32.gmra.mxu2 %v2325_v49  ;;  %951 = vmax.xlane.f32.xlu2 %v950_v59  ;;  %v1190_v1 = vadd.f32 %v2325_v49, %v2323_v50 }
 0x323   : > { %2328 = vpow2.f32 %v1076_v40 }
 0x324   : > { %1191 = vadd.xlane.f32.xlu0 %v1190_v1 }
 0x325   : > { %v910_v48 = vpop.xlane.xlu1 %909 }
 0x326   : > { %v994_v30 = vsub.f32 %v3293_v19, %v910_v48  ;;  %v995_v27 = vsub.f32 %v3328_v55, %v910_v48  ;;  %v3470_v1 = vpop.f32.mrf.mxu3 }
 0x327   : > { %v3449_v54 = vpop.f32.mrf.mxu0 }
 0x328   : > { %v2327_v52 = vpop.eup %2326  ;;  %v1078_v15 = vmul.f32 1.442695, %v994_v30  ;;  %v1080_v39 = vmul.f32 1.442695, %v995_v27  ;;  %v953_v51 = vmax.f32 %v3434_v43, %v3449_v54 }
 0x329   : > { %v2329_v2 = vpop.eup %2328  ;;  %1305 = vmatmul.f32.gmra.mxu1 %v2327_v52 }
 0x32a   : > { %2330 = vpow2.f32 %v1078_v15  ;;  %1418 = vmatmul.f32.gmra.mxu2 %v2329_v2  ;;  %954 = vmax.xlane.f32.xlu1 %v953_v51  ;;  %v1193_v47 = vadd.f32 %v2329_v2, %v2327_v52 }
 0x32b   : > { %2332 = vpow2.f32 %v1080_v39 }
 0x32c   : > { %1194 = vadd.xlane.f32.xlu2 %v1193_v47 }
 0x32d   : > { %v913_v19 = vpop.xlane.xlu2 %912 }
 0x32e   : > { %v996_v55 = vsub.f32 %v3302_v37, %v913_v19  ;;  %v997_v18 = vsub.f32 %v3333_v31, %v913_v19  ;;  %v1982_v37 = vld [vmem:[%s3833_s3 + $0x70] sm:$0xff]  ;;  %v3478_v47 = vpop.f32.mrf.mxu3 }
 0x32f   : > { %v3455_v63 = vpop.f32.mrf.mxu0  ;;  %2238 = vmatpush.msrb.mxu3 %v1982_v37  ;;  %2237 = vmatpush.msra.mxu2 %v1982_v37 }
 0x330   : > { %v2331_v35 = vpop.eup %2330  ;;  %v1082_v16 = vmul.f32 1.442695, %v996_v55  ;;  %v1084_v5 = vmul.f32 1.442695, %v997_v18  ;;  %v956_v61 = vmax.f32 %v3445_v38, %v3455_v63  ;;  %1989 = vmatpush.msra.mxu0 %v1982_v37  ;;  %2236 = vmatpush.msra.mxu1 %v1982_v37 }
 0x331   : > { %v2333_v45 = vpop.eup %2332  ;;  %1308 = vmatmul.f32.gmra.mxu1 %v2331_v35 }
 0x332   : > { %2334 = vpow2.f32 %v1082_v16  ;;  %1421 = vmatmul.f32.gmra.mxu2 %v2333_v45  ;;  %957 = vmax.xlane.f32.xlu0 %v956_v61  ;;  %v1196_v0 = vadd.f32 %v2333_v45, %v2331_v35 }
 0x333   : > { %2336 = vpow2.f32 %v1084_v5 }
 0x334   : > { %1197 = vadd.xlane.f32.xlu1 %v1196_v0  ;;  %v1980_v0 = vld [vmem:[%s3833_s3 + $0x60] sm:$0xff] }
 0x335   : > { %v916_v31 = vpop.xlane.xlu0 %915 }
 0x336   : > { %v998_v3 = vsub.f32 %v3311_v6, %v916_v31  ;;  %v999_v33 = vsub.f32 %v3340_v60, %v916_v31  ;;  %v3495_v31 = vpop.f32.mrf.mxu3 }
 0x337   : > { %v3466_v22 = vpop.f32.mrf.mxu0 }
 0x338   : > { %v2335_v50 = vpop.eup %2334  ;;  %v1086_v46 = vmul.f32 1.442695, %v998_v3  ;;  %v1088_v40 = vmul.f32 1.442695, %v999_v33  ;;  %v959_v59 = vmax.f32 %v3457_v53, %v3466_v22  ;;  %v1978_v3 = vld [vmem:[%s3833_s3 + $0x50] sm:$0xff] }
 0x339   : > { %v2337_v49 = vpop.eup %2336  ;;  %1311 = vmatmul.f32.gmra.mxu1 %v2335_v50 }
 0x33a   : > { %2338 = vpow2.f32 %v1086_v46  ;;  %1424 = vmatmul.f32.gmra.mxu2 %v2337_v49  ;;  %960 = vmax.xlane.f32.xlu2 %v959_v59  ;;  %v1199_v26 = vadd.f32 %v2337_v49, %v2335_v50 }
 0x33b   : > { %2340 = vpow2.f32 %v1088_v40 }
 0x33c   : > { %1200 = vadd.xlane.f32.xlu0 %v1199_v26 }
 0x33d   : > { %v919_v6 = vpop.xlane.xlu1 %918 }
 0x33e   : > { %v1000_v60 = vsub.f32 %v3319_v9, %v919_v6  ;;  %v1001_v48 = vsub.f32 %v3347_v13, %v919_v6  ;;  %v1981_v9 = vld [vmem:[%s3833_s3 + $0x68] sm:$0xff] }
 0x33f   : > { %v3474_v30 = vpop.f32.mrf.mxu0  ;;  %2241 = vmatpush.msrb.mxu3 %v1981_v9  ;;  %2240 = vmatpush.msra.mxu2 %v1981_v9  ;;  %v1977_v6 = vld [vmem:[%s3833_s3 + $0x48] sm:$0xff] }
 0x340   : > { %v2339_v27 = vpop.eup %2338  ;;  %v1090_v52 = vmul.f32 1.442695, %v1000_v60  ;;  %v1092_v15 = vmul.f32 1.442695, %v1001_v48  ;;  %v962_v39 = vmax.f32 %v3470_v1, %v3474_v30  ;;  %2239 = vmatpush.msra.mxu1 %v1981_v9  ;;  %1990 = vmatpush.msra.mxu0 %v1981_v9  ;;  %v1976_v60 = vld [vmem:[%s3833_s3 + $0x40] sm:$0xff]  ;;  %v1975_v48 = vld [vmem:[%s3833_s3 + $0x38] sm:$0xff] }
 0x341   : > { %v2341_v51 = vpop.eup %2340  ;;  %1314 = vmatmul.f32.gmra.mxu1 %v2339_v27  ;;  %2244 = vmatpush.msrb.mxu3 %v1980_v0 }
 0x342   : > { %2342 = vpow2.f32 %v1090_v52  ;;  %1427 = vmatmul.f32.gmra.mxu2 %v2341_v51  ;;  %963 = vmax.xlane.f32.xlu1 %v962_v39  ;;  %v1202_v2 = vadd.f32 %v2341_v51, %v2339_v27  ;;  %v1974_v39 = vld [vmem:[%s3833_s3 + $0x30] sm:$0xff]  ;;  %v3520_v51 = vpop.f32.mrf.mxu3 }
 0x343   : > { %2344 = vpow2.f32 %v1092_v15  ;;  %2243 = vmatpush.msra.mxu2 %v1980_v0  ;;  %2242 = vmatpush.msra.mxu1 %v1980_v0 }
 0x344   : > { %1203 = vadd.xlane.f32.xlu2 %v1202_v2  ;;  %1991 = vmatpush.msra.mxu0 %v1980_v0 }
 0x345   : > { %v922_v13 = vpop.xlane.xlu2 %921 }
 0x346   : > { %v1002_v19 = vsub.f32 %v3326_v44, %v922_v13  ;;  %v1003_v55 = vsub.f32 %v3354_v21, %v922_v13  ;;  %v1979_v21 = vld [vmem:[%s3833_s3 + $0x58] sm:$0xff] }
 0x347   : > { %v3485_v18 = vpop.f32.mrf.mxu0  ;;  %2247 = vmatpush.msrb.mxu3 %v1979_v21  ;;  %2246 = vmatpush.msra.mxu2 %v1979_v21 }
 0x348   : > { %v2343_v35 = vpop.eup %2342  ;;  %v1094_v16 = vmul.f32 1.442695, %v1002_v19  ;;  %v1096_v5 = vmul.f32 1.442695, %v1003_v55  ;;  %v965_v61 = vmax.f32 %v3478_v47, %v3485_v18  ;;  %2245 = vmatpush.msra.mxu1 %v1979_v21  ;;  %1992 = vmatpush.msra.mxu0 %v1979_v21  ;;  %v1970_v21 = vld [vmem:[%s3833_s3 + $0x10] sm:$0xff] }
 0x349   : > { %v2345_v45 = vpop.eup %2344  ;;  %1317 = vmatmul.f32.gmra.mxu1 %v2343_v35  ;;  %2250 = vmatpush.msrb.mxu3 %v1978_v3 }
 0x34a   : > { %2346 = vpow2.f32 %v1094_v16  ;;  %1430 = vmatmul.f32.gmra.mxu2 %v2345_v45  ;;  %966 = vmax.xlane.f32.xlu0 %v965_v61  ;;  %v1205_v44 = vadd.f32 %v2345_v45, %v2343_v35  ;;  %v1972_v16 = vld [vmem:[%s3833_s3 + $0x20] sm:$0xff] }
 0x34b   : > { %2348 = vpow2.f32 %v1096_v5  ;;  %2249 = vmatpush.msra.mxu2 %v1978_v3  ;;  %2248 = vmatpush.msra.mxu1 %v1978_v3  ;;  %v1971_v5 = vld [vmem:[%s3833_s3 + $0x18] sm:$0xff] }
 0x34c   : > { %1206 = vadd.xlane.f32.xlu1 %v1205_v44  ;;  %2253 = vmatpush.msrb.mxu3 %v1977_v6 }
 0x34d   : > { %v925_v37 = vpop.xlane.xlu0 %924  ;;  %2252 = vmatpush.msra.mxu2 %v1977_v6  ;;  %2251 = vmatpush.msra.mxu1 %v1977_v6 }
 0x34e   : > { %v1004_v33 = vsub.f32 %v3335_v62, %v925_v37  ;;  %v1005_v50 = vsub.f32 %v3363_v7, %v925_v37  ;;  %2256 = vmatpush.msrb.mxu3 %v1976_v60  ;;  %1993 = vmatpush.msra.mxu0 %v1978_v3 }
 0x34f   : > { %v3502_v46 = vpop.f32.mrf.mxu0  ;;  %2255 = vmatpush.msra.mxu2 %v1976_v60  ;;  %2254 = vmatpush.msra.mxu1 %v1976_v60 }
 0x350   : > { %v2347_v40 = vpop.eup %2346  ;;  %v1098_v59 = vmul.f32 1.442695, %v1004_v33  ;;  %v1100_v49 = vmul.f32 1.442695, %v1005_v50  ;;  %v968_v26 = vmax.f32 %v3495_v31, %v3502_v46  ;;  %2259 = vmatpush.msrb.mxu3 %v1975_v48  ;;  %1994 = vmatpush.msra.mxu0 %v1977_v6  ;;  %v1969_v50 = vld [vmem:[%s3833_s3 + $0x8] sm:$0xff] }
 0x351   : > { %v2349_v62 = vpop.eup %2348  ;;  %1320 = vmatmul.f32.gmra.mxu1 %v2347_v40  ;;  %2258 = vmatpush.msra.mxu2 %v1975_v48 }
 0x352   : > { %2350 = vpow2.f32 %v1098_v59  ;;  %1433 = vmatmul.f32.gmra.mxu2 %v2349_v62  ;;  %969 = vmax.xlane.f32.xlu2 %v968_v26  ;;  %v1208_v7 = vadd.f32 %v2349_v62, %v2347_v40  ;;  %v1968_v40 = vld [vmem:[%s3833_s3] sm:$0xff] }
 0x353   : > { %2352 = vpow2.f32 %v1100_v49  ;;  %2262 = vmatpush.msrb.mxu3 %v1974_v39  ;;  %2257 = vmatpush.msra.mxu1 %v1975_v48 }
 0x354   : > { %1209 = vadd.xlane.f32.xlu0 %v1208_v7  ;;  %2261 = vmatpush.msra.mxu2 %v1974_v39 }
 0x355   : > { %v928_v27 = vpop.xlane.xlu1 %927  ;;  %2260 = vmatpush.msra.mxu1 %v1974_v39  ;;  %1995 = vmatpush.msra.mxu0 %v1976_v60 }
 0x356   : > { %v1006_v52 = vsub.f32 %v3344_v20, %v928_v27  ;;  %v1007_v15 = vsub.f32 %v3370_v4, %v928_v27  ;;  %v1973_v4 = vld [vmem:[%s3833_s3 + $0x28] sm:$0xff] }
 0x357   : > { %v3522_v2 = vpop.f32.mrf.mxu0  ;;  %2265 = vmatpush.msrb.mxu3 %v1973_v4  ;;  %2264 = vmatpush.msra.mxu2 %v1973_v4 }
 0x358   : > { %v2351_v9 = vpop.eup %2350  ;;  %v1102_v13 = vmul.f32 1.442695, %v1006_v52  ;;  %v1104_v19 = vmul.f32 1.442695, %v1007_v15  ;;  %v971_v20 = vmax.f32 %v3520_v51, %v3522_v2  ;;  %2263 = vmatpush.msra.mxu1 %v1973_v4  ;;  %1996 = vmatpush.msra.mxu0 %v1975_v48 }
 0x359   : > { %v2353_v55 = vpop.eup %2352  ;;  %1323 = vmatmul.f32.gmra.mxu1 %v2351_v9  ;;  %2268 = vmatpush.msrb.mxu3 %v1972_v16 }
 0x35a   : > { %2354 = vpow2.f32 %v1102_v13  ;;  %1436 = vmatmul.f32.gmra.mxu2 %v2353_v55  ;;  %972 = vmax.xlane.f32.xlu1 %v971_v20  ;;  %v1211_v35 = vadd.f32 %v2353_v55, %v2351_v9 }
 0x35b   : > { %2356 = vpow2.f32 %v1104_v19  ;;  %2271 = vmatpush.msrb.mxu3 %v1971_v5  ;;  %2267 = vmatpush.msra.mxu2 %v1972_v16 }
 0x35c   : > { %1212 = vadd.xlane.f32.xlu2 %v1211_v35  ;;  %2266 = vmatpush.msra.mxu1 %v1972_v16 }
 0x35d   : > { %v931_v61 = vpop.xlane.xlu2 %930  ;;  %2274 = vmatpush.msrb.mxu3 %v1970_v21  ;;  %2270 = vmatpush.msra.mxu2 %v1971_v5 }
 0x35e   : > { %v1008_v45 = vsub.f32 %v3352_v32, %v931_v61  ;;  %v1009_v0 = vsub.f32 %v3380_v58, %v931_v61  ;;  %v1279_v44 = vpop.f32.mrf.mxu1  ;;  %2269 = vmatpush.msra.mxu1 %v1971_v5  ;;  %1997 = vmatpush.msra.mxu0 %v1974_v39 }
 0x35f   : > { %2277 = vmatpush.msrb.mxu3 %v1969_v50  ;;  %2273 = vmatpush.msra.mxu2 %v1970_v21 }
 0x360   : > { %v2355_v37 = vpop.eup %2354  ;;  %v1106_v3 = vmul.f32 1.442695, %v1008_v45  ;;  %v1108_v33 = vmul.f32 1.442695, %v1009_v0  ;;  %2272 = vmatpush.msra.mxu1 %v1970_v21  ;;  %1998 = vmatpush.msra.mxu0 %v1973_v4 }
 0x361   : > { %v2357_v32 = vpop.eup %2356  ;;  %1326 = vmatmul.f32.gmra.mxu1 %v2355_v37  ;;  %2280 = vmatpush.msrb.mxu3 %v1968_v40 }
 0x362   : > { %2358 = vpow2.f32 %v1106_v3  ;;  %1439 = vmatmul.f32.gmra.mxu2 %v2357_v32  ;;  %v1214_v58 = vadd.f32 %v2357_v32, %v2355_v37  ;;  %2275 = vmatpush.msra.mxu1 %v1969_v50 }
 0x363   : > { %2360 = vpow2.f32 %v1108_v33  ;;  %2276 = vmatpush.msra.mxu2 %v1969_v50  ;;  %1999 = vmatpush.msra.mxu0 %v1972_v16 }
 0x364   : > { %1215 = vadd.xlane.f32.xlu0 %v1214_v58  ;;  %2278 = vmatpush.msra.mxu1 %v1968_v40 }
 0x365   : > { %v1392_v59 = vpop.f32.mrf.mxu2  ;;  %v934_v49 = vpop.xlane.xlu0 %933  ;;  %2279 = vmatpush.msra.mxu2 %v1968_v40  ;;  %2000 = vmatpush.msra.mxu0 %v1971_v5 }
 0x366   : > { %v3546_v26 = vadd.f32 %v1392_v59, %v1279_v44  ;;  %v1010_v6 = vsub.f32 %v3359_v17, %v934_v49  ;;  %v1011_v62 = vsub.f32 %v3390_v36, %v934_v49  ;;  %v1282_v7 = vpop.f32.mrf.mxu1 }
 0x367   : > { %2001 = vmatpush.msra.mxu0 %v1970_v21 }
 0x368   : > { %v2359_v60 = vpop.eup %2358  ;;  %v1110_v48 = vmul.f32 1.442695, %v1010_v6  ;;  %v1112_v27 = vmul.f32 1.442695, %v1011_v62 }
 0x369   : > { %v2361_v52 = vpop.eup %2360  ;;  %1329 = vmatmul.f32.gmra.mxu1 %v2359_v60  ;;  %2002 = vmatpush.msra.mxu0 %v1969_v50 }
 0x36a   : > { %2362 = vpow2.f32 %v1110_v48  ;;  %1442 = vmatmul.f32.gmra.mxu2 %v2361_v52  ;;  %v1217_v15 = vadd.f32 %v2361_v52, %v2359_v60 }
 0x36b   : > { %2364 = vpow2.f32 %v1112_v27  ;;  %2003 = vmatpush.msra.mxu0 %v1968_v40 }
 0x36c   : > { %1218 = vadd.xlane.f32.xlu1 %v1217_v15 }
 0x36d   : > { %v1395_v17 = vpop.f32.mrf.mxu2  ;;  %v937_v36 = vpop.xlane.xlu1 %936 }
 0x36e   : > { %v3550_v39 = vadd.f32 %v1395_v17, %v1282_v7  ;;  %v1012_v9 = vsub.f32 %v3372_v56, %v937_v36  ;;  %v1013_v13 = vsub.f32 %v3400_v57, %v937_v36  ;;  %v1285_v19 = vpop.f32.mrf.mxu1 }
 0x36f   : > { %v1177_v20 = vpop.xlane.xlu2 %1176 }
 0x370   : > { %v2363_v4 = vpop.eup %2362  ;;  %v1114_v55 = vmul.f32 1.442695, %v1012_v9  ;;  %v1116_v35 = vmul.f32 1.442695, %v1013_v13  ;;  %2366 = vrcp.f32 %v1177_v20  ;;  %v1544_v59 = vand.u32 2147483648, %v1177_v20 }
 0x371   : > { %v2365_v16 = vpop.eup %2364  ;;  %1332 = vmatmul.f32.gmra.mxu1 %v2363_v4  ;;  %vm1538_vm1 = vweird.f32 %v1177_v20 }
 0x372   : > { %2368 = vpow2.f32 %v1114_v55  ;;  %1445 = vmatmul.f32.gmra.mxu2 %v2365_v16  ;;  %v1220_v5 = vadd.f32 %v2365_v16, %v2363_v4  ;;  %v1545_v48 = vor.u32 1.1754944e-38, %v1544_v59 }
 0x373   : > { %2370 = vpow2.f32 %v1116_v35 }
 0x374   : > { %1221 = vadd.xlane.f32.xlu2 %v1220_v5 }
 0x375   : > { %v1398_v61 = vpop.f32.mrf.mxu2  ;;  %v940_v45 = vpop.xlane.xlu0 %939 }
 0x376   : > { %v2367_v56 = vpop.eup %2366  ;;  %v3554_v0 = vadd.f32 %v1398_v61, %v1285_v19  ;;  %v1014_v57 = vsub.f32 %v3384_v25, %v940_v45  ;;  %v1015_v44 = vsub.f32 %v3408_v11, %v940_v45  ;;  %v1288_v21 = vpop.f32.mrf.mxu1  ;;  %v1542_v25 = vand.u32 2147483647, %v1177_v20 }
 0x377   : > { %v1534_v37 = vmul.f32 %v2367_v56, %v1177_v20  ;;  %v3558_v3 = vpop.xlane.xlu1 %1179  ;;  %vm1539_vm0 = vweird.f32 %v2367_v56 }
 0x378   : > { %v2369_v33 = vpop.eup %2368  ;;  %v1118_v50 = vmul.f32 1.442695, %v1014_v57  ;;  %v1120_v32 = vmul.f32 1.442695, %v1015_v44  ;;  %2372 = vrcp.f32 %v3558_v3  ;;  %vm1540_vm2 = vmor %vm1538_vm1, %vm1539_vm0  ;;  %vm1543_vm3 = vcmp.eq.f32.partialorder %v1542_v25, 8.507059e+37 }
 0x379   : > { %v2371_v58 = vpop.eup %2370  ;;  %v1535_v40 = vsub.f32 1.0, %v1534_v37  ;;  %1335 = vmatmul.f32.gmra.mxu1 %v2369_v33  ;;  %v1557_v45 = vand.u32 2147483647, %v3558_v3  ;;  %vm1553_vm5 = vweird.f32 %v3558_v3 }
 0x37a   : > { %2374 = vpow2.f32 %v1118_v50  ;;  %1448 = vmatmul.f32.gmra.mxu2 %v2371_v58  ;;  %v1223_v49 = vadd.f32 %v2371_v58, %v2369_v33 }
 0x37b   : > { %v1536_v6 = vmul.f32 %v2367_v56, %v1535_v40  ;;  %2376 = vpow2.f32 %v1120_v32  ;;  %vm1558_vm7 = vcmp.eq.f32.partialorder %v1557_v45, 8.507059e+37 }
 0x37c   : > { %1224 = vadd.xlane.f32.xlu0 %v1223_v49 }
 0x37d   : > { %v1401_v11 = vpop.f32.mrf.mxu2  ;;  %v1537_v62 = vadd.f32 %v2367_v56, %v1536_v6  ;;  %v943_v7 = vpop.xlane.xlu2 %942 }
 0x37e   : > { %v2373_v60 = vpop.eup %2372  ;;  %v1402_v27 = vadd.f32 %v1401_v11, %v1288_v21  ;;  %v1016_v52 = vsub.f32 %v3396_v24, %v943_v7  ;;  %v1017_v15 = vsub.f32 %v3414_v34, %v943_v7  ;;  %v1291_v17 = vpop.f32.mrf.mxu1  ;;  %v1559_v24 = vand.u32 2147483648, %v3558_v3 }
 0x37f   : > { %v1549_v36 = vmul.f32 %v2373_v60, %v3558_v3  ;;  %v1541_v9 = vsel %vm1540_vm2, %v2367_v56, %v1537_v62  ;;  %v3564_v13 = vpop.xlane.xlu0 %1182  ;;  %vm1554_vm4 = vweird.f32 %v2373_v60 }
 0x380   : > { %v2375_v19 = vpop.eup %2374  ;;  %v1546_v20 = vsel %vm1543_vm3, %v1545_v48, %v1541_v9  ;;  %v1122_v4 = vmul.f32 1.442695, %v1016_v52  ;;  %v1124_v55 = vmul.f32 1.442695, %v1017_v15  ;;  %2378 = vrcp.f32 %v3564_v13  ;;  %vm1555_vm6 = vmor %vm1553_vm5, %vm1554_vm4 }
 0x381   : > { %v2377_v35 = vpop.eup %2376  ;;  %v1550_v16 = vsub.f32 1.0, %v1549_v36  ;;  %v1547_v5 = vmul.f32 %v1546_v20, %v1402_v27  ;;  %1338 = vmatmul.f32.gmra.mxu1 %v2375_v19  ;;  %v1560_v37 = vor.u32 1.1754944e-38, %v1559_v24  ;;  %vm1568_vm9 = vweird.f32 %v3564_v13 }
 0x382   : > { %2380 = vpow2.f32 %v1122_v4  ;;  %1451 = vmatmul.f32.gmra.mxu2 %v2377_v35  ;;  %v1226_v34 = vadd.f32 %v2377_v35, %v2375_v19 }
 0x383   : > { %v1551_v61 = vmul.f32 %v2373_v60, %v1550_v16  ;;  %2382 = vpow2.f32 %v1124_v55  ;;  %2013 = vmatmul.f32.vlgmr.msrb.gmra.mxu3 %v1547_v5 }
 0x384   : > { %1227 = vadd.xlane.f32.xlu1 %v1226_v34 }
 0x385   : > { %v1404_v56 = vpop.f32.mrf.mxu2  ;;  %v1552_v57 = vadd.f32 %v2373_v60, %v1551_v61  ;;  %v946_v44 = vpop.xlane.xlu1 %945 }
 0x386   : > { %v2379_v21 = vpop.eup %2378  ;;  %v1405_v33 = vadd.f32 %v1404_v56, %v1291_v17  ;;  %v1018_v50 = vsub.f32 %v3404_v42, %v946_v44  ;;  %v1019_v32 = vsub.f32 %v3422_v29, %v946_v44  ;;  %v1294_v58 = vpop.f32.mrf.mxu1  ;;  %v1574_v42 = vand.u32 2147483648, %v3564_v13 }
 0x387   : > { %v1564_v40 = vmul.f32 %v2379_v21, %v3564_v13  ;;  %v1556_v59 = vsel %vm1555_vm6, %v2373_v60, %v1552_v57  ;;  %v3573_v49 = vpop.xlane.xlu2 %1185  ;;  %vm1569_vm8 = vweird.f32 %v2379_v21  ;;  %v1572_v60 = vand.u32 2147483647, %v3564_v13 }
 0x388   : > { %v2381_v6 = vpop.eup %2380  ;;  %v1561_v3 = vsel %vm1558_vm7, %v1560_v37, %v1556_v59  ;;  %v1126_v25 = vmul.f32 1.442695, %v1018_v50  ;;  %v1128_v11 = vmul.f32 1.442695, %v1019_v32  ;;  %2384 = vrcp.f32 %v3573_v49  ;;  %vm1570_vm10 = vmor %vm1568_vm9, %vm1569_vm8 }
 0x389   : > { %v2383_v62 = vpop.eup %2382  ;;  %v1565_v7 = vsub.f32 1.0, %v1564_v40  ;;  %v1562_v48 = vmul.f32 %v1561_v3, %v1405_v33  ;;  %1341 = vmatmul.f32.gmra.mxu1 %v2381_v6  ;;  %v1575_v9 = vor.u32 1.1754944e-38, %v1574_v42  ;;  %vm1573_vm11 = vcmp.eq.f32.partialorder %v1572_v60, 8.507059e+37 }
 0x38a   : > { %2386 = vpow2.f32 %v1126_v25  ;;  %1454 = vmatmul.f32.gmra.mxu2 %v2383_v62  ;;  %v1229_v29 = vadd.f32 %v2383_v62, %v2381_v6  ;;  %vm1583_vm13 = vweird.f32 %v3573_v49 }
 0x38b   : > { %v1566_v27 = vmul.f32 %v2379_v21, %v1565_v7  ;;  %2388 = vpow2.f32 %v1128_v11  ;;  %2016 = vmatmul.f32.gmra.mxu3 %v1562_v48 }
 0x38c   : > { %1230 = vadd.xlane.f32.xlu2 %v1229_v29 }
 0x38d   : > { %v1407_v52 = vpop.f32.mrf.mxu2  ;;  %v1567_v15 = vadd.f32 %v2379_v21, %v1566_v27  ;;  %v949_v17 = vpop.xlane.xlu0 %948 }
 0x38e   : > { %v2385_v36 = vpop.eup %2384  ;;  %v1408_v19 = vadd.f32 %v1407_v52, %v1294_v58  ;;  %v1020_v20 = vsub.f32 %v3416_v12, %v949_v17  ;;  %v1021_v4 = vsub.f32 %v3430_v23, %v949_v17  ;;  %v1297_v55 = vpop.f32.mrf.mxu1  ;;  %v1589_v12 = vand.u32 2147483648, %v3573_v49 }
 0x38f   : > { %v1579_v35 = vmul.f32 %v2385_v36, %v3573_v49  ;;  %v1571_v16 = vsel %vm1570_vm10, %v2379_v21, %v1567_v15  ;;  %v3582_v5 = vpop.xlane.xlu1 %1188  ;;  %vm1584_vm12 = vweird.f32 %v2385_v36  ;;  %v1587_v21 = vand.u32 2147483647, %v3573_v49 }
 0x390   : > { %v2387_v24 = vpop.eup %2386  ;;  %v1576_v13 = vsel %vm1573_vm11, %v1575_v9, %v1571_v16  ;;  %v1130_v34 = vmul.f32 1.442695, %v1020_v20  ;;  %v1132_v61 = vmul.f32 1.442695, %v1021_v4  ;;  %2390 = vrcp.f32 %v3582_v5  ;;  %vm1585_vm14 = vmor %vm1583_vm13, %vm1584_vm12 }
 0x391   : > { %v2389_v45 = vpop.eup %2388  ;;  %v1580_v56 = vsub.f32 1.0, %v1579_v35  ;;  %v1577_v57 = vmul.f32 %v1576_v13, %v1408_v19  ;;  %1344 = vmatmul.f32.gmra.mxu1 %v2387_v24  ;;  %v1590_v58 = vor.u32 1.1754944e-38, %v1589_v12  ;;  %vm1588_vm15 = vcmp.eq.f32.partialorder %v1587_v21, 8.507059e+37 }
 0x392   : > { %2392 = vpow2.f32 %v1130_v34  ;;  %1457 = vmatmul.f32.gmra.mxu2 %v2389_v45  ;;  %v1232_v23 = vadd.f32 %v2389_v45, %v2387_v24  ;;  %v1602_v15 = vand.u32 2147483647, %v3582_v5  ;;  %vm1598_vm1 = vweird.f32 %v3582_v5 }
 0x393   : > { %v1581_v44 = vmul.f32 %v2385_v36, %v1580_v56  ;;  %2394 = vpow2.f32 %v1132_v61  ;;  %2019 = vmatmul.f32.gmra.mxu3 %v1577_v57 }
 0x394   : > { %1233 = vadd.xlane.f32.xlu0 %v1232_v23  ;;  %vm1603_vm3 = vcmp.eq.f32.partialorder %v1602_v15, 8.507059e+37 }
 0x395   : > { %v1410_v37 = vpop.f32.mrf.mxu2  ;;  %v1582_v33 = vadd.f32 %v2385_v36, %v1581_v44  ;;  %v952_v50 = vpop.xlane.xlu2 %951 }
 0x396   : > { %v2391_v32 = vpop.eup %2390  ;;  %v1411_v40 = vadd.f32 %v1410_v37, %v1297_v55  ;;  %v1022_v59 = vsub.f32 %v3426_v41, %v952_v50  ;;  %v1023_v6 = vsub.f32 %v3438_v14, %v952_v50  ;;  %v1300_v3 = vpop.f32.mrf.mxu1  ;;  %v1604_v41 = vand.u32 2147483648, %v3582_v5 }
 0x397   : > { %v1594_v25 = vmul.f32 %v2391_v32, %v3582_v5  ;;  %v1586_v11 = vsel %vm1585_vm14, %v2385_v36, %v1582_v33  ;;  %v3591_v62 = vpop.xlane.xlu0 %1191  ;;  %vm1599_vm0 = vweird.f32 %v2391_v32 }
 0x398   : > { %v2393_v7 = vpop.eup %2392  ;;  %v1591_v49 = vsel %vm1588_vm15, %v1590_v58, %v1586_v11  ;;  %v1134_v48 = vmul.f32 1.442695, %v1022_v59  ;;  %v1136_v42 = vmul.f32 1.442695, %v1023_v6  ;;  %2396 = vrcp.f32 %v3591_v62  ;;  %vm1600_vm2 = vmor %vm1598_vm1, %vm1599_vm0 }
 0x399   : > { %v2395_v29 = vpop.eup %2394  ;;  %v1595_v27 = vsub.f32 1.0, %v1594_v25  ;;  %v1592_v60 = vmul.f32 %v1591_v49, %v1411_v40  ;;  %1347 = vmatmul.f32.gmra.mxu1 %v2393_v7  ;;  %v1605_v20 = vor.u32 1.1754944e-38, %v1604_v41  ;;  %v1617_v21 = vand.u32 2147483647, %v3591_v62 }
 0x39a   : > { %2398 = vpow2.f32 %v1134_v48  ;;  %1460 = vmatmul.f32.gmra.mxu2 %v2395_v29  ;;  %v1235_v14 = vadd.f32 %v2395_v29, %v2393_v7  ;;  %vm1613_vm5 = vweird.f32 %v3591_v62 }
 0x39b   : > { %v1596_v52 = vmul.f32 %v2391_v32, %v1595_v27  ;;  %2400 = vpow2.f32 %v1136_v42  ;;  %2022 = vmatmul.f32.gmra.mxu3 %v1592_v60  ;;  %vm1618_vm7 = vcmp.eq.f32.partialorder %v1617_v21, 8.507059e+37 }
 0x39c   : > { %1236 = vadd.xlane.f32.xlu1 %v1235_v14 }
 0x39d   : > { %v1413_v17 = vpop.f32.mrf.mxu2  ;;  %v1597_v36 = vadd.f32 %v2391_v32, %v1596_v52  ;;  %v955_v9 = vpop.xlane.xlu1 %954 }
 0x39e   : > { %v2397_v19 = vpop.eup %2396  ;;  %v1414_v4 = vadd.f32 %v1413_v17, %v1300_v3  ;;  %v1024_v55 = vsub.f32 %v3434_v43, %v955_v9  ;;  %v1025_v35 = vsub.f32 %v3449_v54, %v955_v9  ;;  %v1303_v16 = vpop.f32.mrf.mxu1  ;;  %v1619_v43 = vand.u32 2147483648, %v3591_v62 }
 0x39f   : > { %v1609_v24 = vmul.f32 %v2397_v19, %v3591_v62  ;;  %v1601_v13 = vsel %vm1600_vm2, %v2391_v32, %v1597_v36  ;;  %v3600_v34 = vpop.xlane.xlu2 %1194  ;;  %vm1614_vm4 = vweird.f32 %v2397_v19 }
 0x3a0   : > { %v2399_v61 = vpop.eup %2398  ;;  %v1606_v5 = vsel %vm1603_vm3, %v1605_v20, %v1601_v13  ;;  %v1138_v45 = vmul.f32 1.442695, %v1024_v55  ;;  %v1140_v56 = vmul.f32 1.442695, %v1025_v35  ;;  %2402 = vrcp.f32 %v3600_v34  ;;  %vm1615_vm6 = vmor %vm1613_vm5, %vm1614_vm4 }
 0x3a1   : > { %v2401_v57 = vpop.eup %2400  ;;  %v1610_v12 = vsub.f32 1.0, %v1609_v24  ;;  %v1607_v23 = vmul.f32 %v1606_v5, %v1414_v4  ;;  %1350 = vmatmul.f32.gmra.mxu1 %v2399_v61  ;;  %v1620_v58 = vor.u32 1.1754944e-38, %v1619_v43  ;;  %v1632_v14 = vand.u32 2147483647, %v3600_v34 }
 0x3a2   : > { %2404 = vpow2.f32 %v1138_v45  ;;  %1463 = vmatmul.f32.gmra.mxu2 %v2401_v57  ;;  %v1238_v54 = vadd.f32 %v2401_v57, %v2399_v61  ;;  %vm1628_vm9 = vweird.f32 %v3600_v34 }
 0x3a3   : > { %v1611_v44 = vmul.f32 %v2397_v19, %v1610_v12  ;;  %2406 = vpow2.f32 %v1140_v56  ;;  %2025 = vmatmul.f32.gmra.mxu3 %v1607_v23  ;;  %vm1633_vm11 = vcmp.eq.f32.partialorder %v1632_v14, 8.507059e+37 }
 0x3a4   : > { %1239 = vadd.xlane.f32.xlu2 %v1238_v54 }
 0x3a5   : > { %v1416_v37 = vpop.f32.mrf.mxu2  ;;  %v1612_v33 = vadd.f32 %v2397_v19, %v1611_v44  ;;  %v958_v50 = vpop.xlane.xlu0 %957 }
 0x3a6   : > { %v2403_v32 = vpop.eup %2402  ;;  %v1417_v40 = vadd.f32 %v1416_v37, %v1303_v16  ;;  %v1026_v59 = vsub.f32 %v3445_v38, %v958_v50  ;;  %v1027_v6 = vsub.f32 %v3455_v63, %v958_v50  ;;  %v1306_v3 = vpop.f32.mrf.mxu1  ;;  %v1634_v63 = vand.u32 2147483648, %v3600_v34 }
 0x3a7   : > { %v1624_v25 = vmul.f32 %v2403_v32, %v3600_v34  ;;  %v1616_v11 = vsel %vm1615_vm6, %v2397_v19, %v1612_v33  ;;  %v3609_v7 = vpop.xlane.xlu1 %1197  ;;  %vm1629_vm8 = vweird.f32 %v2403_v32 }
 0x3a8   : > { %v2405_v49 = vpop.eup %2404  ;;  %v1621_v62 = vsel %vm1618_vm7, %v1620_v58, %v1616_v11  ;;  %v1142_v48 = vmul.f32 1.442695, %v1026_v59  ;;  %v1144_v42 = vmul.f32 1.442695, %v1027_v6  ;;  %2408 = vrcp.f32 %v3609_v7  ;;  %vm1630_vm10 = vmor %vm1628_vm9, %vm1629_vm8 }
 0x3a9   : > { %v2407_v29 = vpop.eup %2406  ;;  %v1625_v27 = vsub.f32 1.0, %v1624_v25  ;;  %v1622_v60 = vmul.f32 %v1621_v62, %v1417_v40  ;;  %1353 = vmatmul.f32.gmra.mxu1 %v2405_v49  ;;  %v1635_v19 = vor.u32 1.1754944e-38, %v1634_v63  ;;  %v1647_v23 = vand.u32 2147483647, %v3609_v7 }
 0x3aa   : > { %2410 = vpow2.f32 %v1142_v48  ;;  %1466 = vmatmul.f32.gmra.mxu2 %v2407_v29  ;;  %v1241_v38 = vadd.f32 %v2407_v29, %v2405_v49  ;;  %vm1643_vm13 = vweird.f32 %v3609_v7 }
 0x3ab   : > { %v1626_v41 = vmul.f32 %v2403_v32, %v1625_v27  ;;  %2412 = vpow2.f32 %v1144_v42  ;;  %2028 = vmatmul.f32.gmra.mxu3 %v1622_v60  ;;  %vm1648_vm15 = vcmp.eq.f32.partialorder %v1647_v23, 8.507059e+37 }
 0x3ac   : > { %1242 = vadd.xlane.f32.xlu0 %v1241_v38 }
 0x3ad   : > { %v1419_v52 = vpop.f32.mrf.mxu2  ;;  %v1627_v15 = vadd.f32 %v2403_v32, %v1626_v41  ;;  %v961_v17 = vpop.xlane.xlu2 %960 }
 0x3ae   : > { %v2409_v36 = vpop.eup %2408  ;;  %v1420_v9 = vadd.f32 %v1419_v52, %v1306_v3  ;;  %v1028_v20 = vsub.f32 %v3457_v53, %v961_v17  ;;  %v1029_v4 = vsub.f32 %v3466_v22, %v961_v17  ;;  %v1309_v55 = vpop.f32.mrf.mxu1  ;;  %v1649_v22 = vand.u32 2147483648, %v3609_v7 }
 0x3af   : > { %v1639_v35 = vmul.f32 %v2409_v36, %v3609_v7  ;;  %v1631_v16 = vsel %vm1630_vm10, %v2403_v32, %v1627_v15  ;;  %v3618_v24 = vpop.xlane.xlu0 %1200  ;;  %vm1644_vm12 = vweird.f32 %v2409_v36 }
 0x3b0   : > { %v2411_v13 = vpop.eup %2410  ;;  %v1636_v34 = vsel %vm1633_vm11, %v1635_v19, %v1631_v16  ;;  %v1146_v61 = vmul.f32 1.442695, %v1028_v20  ;;  %v1148_v5 = vmul.f32 1.442695, %v1029_v4  ;;  %2414 = vrcp.f32 %v3618_v24  ;;  %vm1645_vm14 = vmor %vm1643_vm13, %vm1644_vm12 }
 0x3b1   : > { %v2413_v45 = vpop.eup %2412  ;;  %v1640_v56 = vsub.f32 1.0, %v1639_v35  ;;  %v1637_v57 = vmul.f32 %v1636_v34, %v1420_v9  ;;  %1356 = vmatmul.f32.gmra.mxu1 %v2411_v13  ;;  %v1650_v33 = vor.u32 1.1754944e-38, %v1649_v22  ;;  %v1662_v29 = vand.u32 2147483647, %v3618_v24 }
 0x3b2   : > { %2416 = vpow2.f32 %v1146_v61  ;;  %1469 = vmatmul.f32.gmra.mxu2 %v2413_v45  ;;  %v1244_v53 = vadd.f32 %v2413_v45, %v2411_v13  ;;  %vm1658_vm1 = vweird.f32 %v3618_v24 }
 0x3b3   : > { %v1641_v12 = vmul.f32 %v2409_v36, %v1640_v56  ;;  %2418 = vpow2.f32 %v1148_v5  ;;  %2031 = vmatmul.f32.gmra.mxu3 %v1637_v57  ;;  %vm1663_vm3 = vcmp.eq.f32.partialorder %v1662_v29, 8.507059e+37 }
 0x3b4   : > { %1245 = vadd.xlane.f32.xlu1 %v1244_v53 }
 0x3b5   : > { %v1422_v43 = vpop.f32.mrf.mxu2  ;;  %v1642_v54 = vadd.f32 %v2409_v36, %v1641_v12  ;;  %v964_v44 = vpop.xlane.xlu1 %963 }
 0x3b6   : > { %v2415_v21 = vpop.eup %2414  ;;  %v1423_v37 = vadd.f32 %v1422_v43, %v1309_v55  ;;  %v1030_v50 = vsub.f32 %v3470_v1, %v964_v44  ;;  %v1031_v32 = vsub.f32 %v3474_v30, %v964_v44  ;;  %v1312_v58 = vpop.f32.mrf.mxu1  ;;  %v1664_v30 = vand.u32 2147483648, %v3618_v24 }
 0x3b7   : > { %v1654_v40 = vmul.f32 %v2415_v21, %v3618_v24  ;;  %v1646_v59 = vsel %vm1645_vm14, %v2409_v36, %v1642_v54  ;;  %v3627_v6 = vpop.xlane.xlu2 %1203  ;;  %vm1659_vm0 = vweird.f32 %v2415_v21 }
 0x3b8   : > { %v2417_v3 = vpop.eup %2416  ;;  %v1651_v25 = vsel %vm1648_vm15, %v1650_v33, %v1646_v59  ;;  %v1150_v11 = vmul.f32 1.442695, %v1030_v50  ;;  %v1152_v7 = vmul.f32 1.442695, %v1031_v32  ;;  %2420 = vrcp.f32 %v3627_v6  ;;  %vm1660_vm2 = vmor %vm1658_vm1, %vm1659_vm0 }
 0x3b9   : > { %v2419_v49 = vpop.eup %2418  ;;  %v1655_v62 = vsub.f32 1.0, %v1654_v40  ;;  %v1652_v48 = vmul.f32 %v1651_v25, %v1423_v37  ;;  %1359 = vmatmul.f32.gmra.mxu1 %v2417_v3  ;;  %v1665_v14 = vor.u32 1.1754944e-38, %v1664_v30  ;;  %v1677_v61 = vand.u32 2147483647, %v3627_v6 }
 0x3ba   : > { %2422 = vpow2.f32 %v1150_v11  ;;  %1472 = vmatmul.f32.gmra.mxu2 %v2419_v49  ;;  %v1247_v1 = vadd.f32 %v2419_v49, %v2417_v3  ;;  %vm1673_vm5 = vweird.f32 %v3627_v6 }
 0x3bb   : > { %v1656_v42 = vmul.f32 %v2415_v21, %v1655_v62  ;;  %2424 = vpow2.f32 %v1152_v7  ;;  %2034 = vmatmul.f32.gmra.mxu3 %v1652_v48  ;;  %vm1678_vm7 = vcmp.eq.f32.partialorder %v1677_v61, 8.507059e+37 }
 0x3bc   : > { %1248 = vadd.xlane.f32.xlu2 %v1247_v1 }
 0x3bd   : > { %v1425_v27 = vpop.f32.mrf.mxu2  ;;  %v1657_v60 = vadd.f32 %v2415_v21, %v1656_v42  ;;  %v967_v38 = vpop.xlane.xlu0 %966 }
 0x3be   : > { %v2421_v63 = vpop.eup %2420  ;;  %v1426_v41 = vadd.f32 %v1425_v27, %v1312_v58  ;;  %v1032_v52 = vsub.f32 %v3478_v47, %v967_v38  ;;  %v1033_v15 = vsub.f32 %v3485_v18, %v967_v38  ;;  %v1315_v17 = vpop.f32.mrf.mxu1  ;;  %v1679_v18 = vand.u32 2147483648, %v3627_v6 }
 0x3bf   : > { %v1669_v36 = vmul.f32 %v2421_v63, %v3627_v6  ;;  %v1661_v9 = vsel %vm1660_vm2, %v2415_v21, %v1657_v60  ;;  %v3636_v19 = vpop.xlane.xlu1 %1206  ;;  %vm1674_vm4 = vweird.f32 %v2421_v63 }
 0x3c0   : > { %v2423_v20 = vpop.eup %2422  ;;  %v1666_v4 = vsel %vm1663_vm3, %v1665_v14, %v1661_v9  ;;  %v1154_v55 = vmul.f32 1.442695, %v1032_v52  ;;  %v1156_v35 = vmul.f32 1.442695, %v1033_v15  ;;  %2426 = vrcp.f32 %v3636_v19  ;;  %vm1675_vm6 = vmor %vm1673_vm5, %vm1674_vm4 }
 0x3c1   : > { %v2425_v16 = vpop.eup %2424  ;;  %v1670_v24 = vsub.f32 1.0, %v1669_v36  ;;  %v1667_v13 = vmul.f32 %v1666_v4, %v1426_v41  ;;  %1362 = vmatmul.f32.gmra.mxu1 %v2423_v20  ;;  %v1680_v22 = vor.u32 1.1754944e-38, %v1679_v18  ;;  %v1692_v3 = vand.u32 2147483647, %v3636_v19 }
 0x3c2   : > { %2428 = vpow2.f32 %v1154_v55  ;;  %1475 = vmatmul.f32.gmra.mxu2 %v2425_v16  ;;  %v1250_v47 = vadd.f32 %v2425_v16, %v2423_v20  ;;  %vm1688_vm9 = vweird.f32 %v3636_v19 }
 0x3c3   : > { %v1671_v34 = vmul.f32 %v2421_v63, %v1670_v24  ;;  %2430 = vpow2.f32 %v1156_v35  ;;  %2037 = vmatmul.f32.gmra.mxu3 %v1667_v13  ;;  %vm1693_vm11 = vcmp.eq.f32.partialorder %v1692_v3, 8.507059e+37 }
 0x3c4   : > { %1251 = vadd.xlane.f32.xlu0 %v1250_v47 }
 0x3c5   : > { %v1428_v5 = vpop.f32.mrf.mxu2  ;;  %v1672_v45 = vadd.f32 %v2421_v63, %v1671_v34  ;;  %v970_v56 = vpop.xlane.xlu2 %969 }
 0x3c6   : > { %v2427_v57 = vpop.eup %2426  ;;  %v1429_v53 = vadd.f32 %v1428_v5, %v1315_v17  ;;  %v1034_v12 = vsub.f32 %v3495_v31, %v970_v56  ;;  %v1035_v23 = vsub.f32 %v3502_v46, %v970_v56  ;;  %v1318_v43 = vpop.f32.mrf.mxu1  ;;  %v1694_v46 = vand.u32 2147483648, %v3636_v19 }
 0x3c7   : > { %v1684_v54 = vmul.f32 %v2427_v57, %v3636_v19  ;;  %v1676_v44 = vsel %vm1675_vm6, %v2421_v63, %v1672_v45  ;;  %v3645_v21 = vpop.xlane.xlu0 %1209  ;;  %vm1689_vm8 = vweird.f32 %v2427_v57 }
 0x3c8   : > { %v2429_v37 = vpop.eup %2428  ;;  %v1681_v33 = vsel %vm1678_vm7, %v1680_v22, %v1676_v44  ;;  %v1158_v50 = vmul.f32 1.442695, %v1034_v12  ;;  %v1160_v32 = vmul.f32 1.442695, %v1035_v23  ;;  %2432 = vrcp.f32 %v3645_v21  ;;  %vm1690_vm10 = vmor %vm1688_vm9, %vm1689_vm8 }
 0x3c9   : > { %v2431_v58 = vpop.eup %2430  ;;  %v1685_v40 = vsub.f32 1.0, %v1684_v54  ;;  %v1682_v59 = vmul.f32 %v1681_v33, %v1429_v53  ;;  %1365 = vmatmul.f32.gmra.mxu1 %v2429_v37  ;;  %v1695_v48 = vor.u32 1.1754944e-38, %v1694_v46  ;;  %v1707_v36 = vand.u32 2147483647, %v3645_v21 }
 0x3ca   : > { %2434 = vpow2.f32 %v1158_v50  ;;  %1478 = vmatmul.f32.gmra.mxu2 %v2431_v58  ;;  %v1253_v31 = vadd.f32 %v2431_v58, %v2429_v37  ;;  %vm1703_vm13 = vweird.f32 %v3645_v21 }
 0x3cb   : > { %v1686_v6 = vmul.f32 %v2427_v57, %v1685_v40  ;;  %2436 = vpow2.f32 %v1160_v32  ;;  %2040 = vmatmul.f32.gmra.mxu3 %v1682_v59  ;;  %vm1708_vm15 = vcmp.eq.f32.partialorder %v1707_v36, 8.507059e+37 }
 0x3cc   : > { %1173 = vadd.xlane.f32.xlu0 %v3394_v10  ;;  %1254 = vadd.xlane.f32.xlu1 %v1253_v31 }
 0x3cd   : > { %v1431_v25 = vpop.f32.mrf.mxu2  ;;  %v1687_v11 = vadd.f32 %v2427_v57, %v1686_v6  ;;  %v973_v7 = vpop.xlane.xlu1 %972 }
 0x3ce   : > { %v2433_v49 = vpop.eup %2432  ;;  %v1432_v62 = vadd.f32 %v1431_v25, %v1318_v43  ;;  %v1036_v1 = vsub.f32 %v3520_v51, %v973_v7  ;;  %v1037_v30 = vsub.f32 %v3522_v2, %v973_v7  ;;  %v1321_v42 = vpop.f32.mrf.mxu1  ;;  %v1709_v2 = vand.u32 2147483648, %v3645_v21 }
 0x3cf   : > { %v1699_v29 = vmul.f32 %v2433_v49, %v3645_v21  ;;  %v1691_v27 = vsel %vm1690_vm10, %v2427_v57, %v1687_v11  ;;  %v1213_v10 = vpop.xlane.xlu2 %1212  ;;  %vm1704_vm12 = vweird.f32 %v2433_v49 }
 0x3d0   : > { %v2435_v60 = vpop.eup %2434  ;;  %v1696_v38 = vsel %vm1693_vm11, %v1695_v48, %v1691_v27  ;;  %v1162_v63 = vmul.f32 1.442695, %v1036_v1  ;;  %v1164_v41 = vmul.f32 1.442695, %v1037_v30  ;;  %2438 = vrcp.f32 %v1213_v10  ;;  %vm1705_vm14 = vmor %vm1703_vm13, %vm1704_vm12 }
 0x3d1   : > { %v2437_v14 = vpop.eup %2436  ;;  %v1700_v52 = vsub.f32 1.0, %v1699_v29  ;;  %v1697_v15 = vmul.f32 %v1696_v38, %v1432_v62  ;;  %1368 = vmatmul.f32.gmra.mxu1 %v2435_v60  ;;  %v1710_v55 = vor.u32 1.1754944e-38, %v1709_v2  ;;  %v1724_v45 = vand.u32 2147483648, %v1213_v10 }
 0x3d2   : > { %2440 = vpow2.f32 %v1162_v63  ;;  %1481 = vmatmul.f32.gmra.mxu2 %v2437_v14  ;;  %v1256_v51 = vadd.f32 %v2437_v14, %v2435_v60  ;;  %v1722_v57 = vand.u32 2147483647, %v1213_v10  ;;  %vm1718_vm1 = vweird.f32 %v1213_v10 }
 0x3d3   : > { %v1701_v17 = vmul.f32 %v2433_v49, %v1700_v52  ;;  %2442 = vpow2.f32 %v1164_v41  ;;  %2043 = vmatmul.f32.gmra.mxu3 %v1697_v15  ;;  %v1725_v43 = vor.u32 1.1754944e-38, %v1724_v45 }
 0x3d4   : > { %1170 = vadd.xlane.f32.xlu0 %v3386_v28  ;;  %1257 = vadd.xlane.f32.xlu2 %v1256_v51  ;;  %vm1723_vm3 = vcmp.eq.f32.partialorder %v1722_v57, 8.507059e+37 }
 0x3d5   : > { %v1434_v9 = vpop.f32.mrf.mxu2  ;;  %v1702_v19 = vadd.f32 %v2433_v49, %v1701_v17 }
 0x3d6   : > { %v2439_v20 = vpop.eup %2438  ;;  %v1435_v4 = vadd.f32 %v1434_v9, %v1321_v42  ;;  %v1324_v35 = vpop.f32.mrf.mxu1 }
 0x3d7   : > { %v1714_v16 = vmul.f32 %v2439_v20, %v1213_v10  ;;  %v1706_v24 = vsel %vm1705_vm14, %v2433_v49, %v1702_v19  ;;  %v1216_v13 = vpop.xlane.xlu0 %1215  ;;  %vm1719_vm0 = vweird.f32 %v2439_v20 }
 0x3d8   : > { %v2441_v47 = vpop.eup %2440  ;;  %v1711_v18 = vsel %vm1708_vm15, %v1710_v55, %v1706_v24  ;;  %2444 = vrcp.f32 %v1216_v13  ;;  %vm1720_vm2 = vmor %vm1718_vm1, %vm1719_vm0  ;;  %v1739_v58 = vand.u32 2147483648, %v1216_v13  ;;  %vm1733_vm5 = vweird.f32 %v1216_v13 }
 0x3d9   : > { %v2443_v34 = vpop.eup %2442  ;;  %v1715_v61 = vsub.f32 1.0, %v1714_v16  ;;  %v1712_v28 = vmul.f32 %v1711_v18, %v1435_v4  ;;  %1371 = vmatmul.f32.gmra.mxu1 %v2441_v47 }
 0x3da   : > { %1484 = vmatmul.f32.gmra.mxu2 %v2443_v34  ;;  %v1259_v5 = vadd.f32 %v2443_v34, %v2441_v47  ;;  %v1740_v3 = vor.u32 1.1754944e-38, %v1739_v58 }
 0x3db   : > { %v1716_v56 = vmul.f32 %v2439_v20, %v1715_v61  ;;  %2046 = vmatmul.f32.gmra.mxu3 %v1712_v28 }
 0x3dc   : > { %1167 = vadd.xlane.f32.xlu2 %v3376_v8  ;;  %1260 = vadd.xlane.f32.xlu1 %v1259_v5  ;;  %v1737_v8 = vand.u32 2147483647, %v1216_v13 }
 0x3dd   : > { %v1437_v53 = vpop.f32.mrf.mxu2  ;;  %v1717_v22 = vadd.f32 %v2439_v20, %v1716_v56 }
 0x3de   : > { %v2445_v12 = vpop.eup %2444  ;;  %v1438_v23 = vadd.f32 %v1437_v53, %v1324_v35  ;;  %v1327_v54 = vpop.f32.mrf.mxu1  ;;  %vm1738_vm7 = vcmp.eq.f32.partialorder %v1737_v8, 8.507059e+37  ;;  %v3663_v8 = vld [vmem:[%s3834_s4] ss:$0 sm:$0xff] }
 0x3df   : > { %v1729_v44 = vmul.f32 %v2445_v12, %v1216_v13  ;;  %v1721_v21 = vsel %vm1720_vm2, %v2439_v20, %v1717_v22  ;;  %v1219_v37 = vpop.xlane.xlu1 %1218  ;;  %vm1734_vm4 = vweird.f32 %v2445_v12 }
 0x3e0   : > { %v1726_v33 = vsel %vm1723_vm3, %v1725_v43, %v1721_v21  ;;  %2446 = vrcp.f32 %v1219_v37  ;;  %vm1735_vm6 = vmor %vm1733_vm5, %vm1734_vm4  ;;  %v1754_v30 = vand.u32 2147483648, %v1219_v37  ;;  %v1752_v29 = vand.u32 2147483647, %v1219_v37 }
 0x3e1   : > { %v1730_v50 = vsub.f32 1.0, %v1729_v44  ;;  %v1727_v32 = vmul.f32 %v1726_v33, %v1438_v23  ;;  %vm1748_vm9 = vweird.f32 %v1219_v37 }
 0x3e2   : > { %v1755_v63 = vor.u32 1.1754944e-38, %v1754_v30  ;;  %vm1753_vm11 = vcmp.eq.f32.partialorder %v1752_v29, 8.507059e+37  ;;  %v2482_v29 = vld [vmem:[%s2613_s30 + $0x18] sm:$0xff] }
 0x3e3   : > { %v1731_v40 = vmul.f32 %v2445_v12, %v1730_v50  ;;  %2049 = vmatmul.f32.gmra.mxu3 %v1727_v32 }
 0x3e5   : > { %v1440_v59 = vpop.f32.mrf.mxu2  ;;  %v1732_v31 = vadd.f32 %v2445_v12, %v1731_v40 }
 0x3e6   : > { %v2447_v46 = vpop.eup %2446  ;;  %v1441_v6 = vadd.f32 %v1440_v59, %v1327_v54  ;;  %v1330_v25 = vpop.f32.mrf.mxu1 }
 0x3e7   : > { %v1744_v11 = vmul.f32 %v2447_v46, %v1219_v37  ;;  %v1736_v7 = vsel %vm1735_vm6, %v2445_v12, %v1732_v31  ;;  %v1222_v49 = vpop.xlane.xlu2 %1221  ;;  %vm1749_vm8 = vweird.f32 %v2447_v46 }
 0x3e8   : > { %v1741_v62 = vsel %vm1738_vm7, %v1740_v3, %v1736_v7  ;;  %2448 = vrcp.f32 %v1222_v49  ;;  %vm1750_vm10 = vmor %vm1748_vm9, %vm1749_vm8  ;;  %v1769_v36 = vand.u32 2147483648, %v1222_v49  ;;  %v1767_v19 = vand.u32 2147483647, %v1222_v49 }
 0x3e9   : > { %v1745_v48 = vsub.f32 1.0, %v1744_v11  ;;  %v1742_v1 = vmul.f32 %v1741_v62, %v1441_v6  ;;  %vm1763_vm13 = vweird.f32 %v1222_v49 }
 0x3ea   : > { %v1770_v16 = vor.u32 1.1754944e-38, %v1769_v36  ;;  %vm1768_vm15 = vcmp.eq.f32.partialorder %v1767_v19, 8.507059e+37 }
 0x3eb   : > { %v1746_v42 = vmul.f32 %v2447_v46, %v1745_v48  ;;  %2052 = vmatmul.f32.gmra.mxu3 %v1742_v1 }
 0x3ed   : > { %v1443_v27 = vpop.f32.mrf.mxu2  ;;  %v1747_v10 = vadd.f32 %v2447_v46, %v1746_v42 }
 0x3ee   : > { %v2449_v60 = vpop.eup %2448  ;;  %v1444_v38 = vadd.f32 %v1443_v27, %v1330_v25  ;;  %v1333_v41 = vpop.f32.mrf.mxu1 }
 0x3ef   : > { %v1759_v14 = vmul.f32 %v2449_v60, %v1222_v49  ;;  %v1751_v52 = vsel %vm1750_vm10, %v2447_v46, %v1747_v10  ;;  %v1225_v15 = vpop.xlane.xlu0 %1224  ;;  %vm1764_vm12 = vweird.f32 %v2449_v60 }
 0x3f0   : > { %v1756_v51 = vsel %vm1753_vm11, %v1755_v63, %v1751_v52  ;;  %2450 = vrcp.f32 %v1225_v15  ;;  %vm1765_vm14 = vmor %vm1763_vm13, %vm1764_vm12  ;;  %v1784_v5 = vand.u32 2147483648, %v1225_v15  ;;  %v1782_v56 = vand.u32 2147483647, %v1225_v15 }
 0x3f1   : > { %v1760_v2 = vsub.f32 1.0, %v1759_v14  ;;  %v1757_v17 = vmul.f32 %v1756_v51, %v1444_v38  ;;  %vm1778_vm1 = vweird.f32 %v1225_v15 }
 0x3f2   : > { %v1785_v23 = vor.u32 1.1754944e-38, %v1784_v5  ;;  %vm1783_vm3 = vcmp.eq.f32.partialorder %v1782_v56, 8.507059e+37 }
 0x3f3   : > { %v1761_v9 = vmul.f32 %v2449_v60, %v1760_v2  ;;  %2055 = vmatmul.f32.gmra.mxu3 %v1757_v17 }
 0x3f5   : > { %v1446_v20 = vpop.f32.mrf.mxu2  ;;  %v1762_v4 = vadd.f32 %v2449_v60, %v1761_v9 }
 0x3f6   : > { %v2451_v55 = vpop.eup %2450  ;;  %v1447_v35 = vadd.f32 %v1446_v20, %v1333_v41  ;;  %v1336_v24 = vpop.f32.mrf.mxu1 }
 0x3f7   : > { %v1774_v13 = vmul.f32 %v2451_v55, %v1225_v15  ;;  %v1766_v47 = vsel %vm1765_vm14, %v2449_v60, %v1762_v4  ;;  %v1228_v18 = vpop.xlane.xlu1 %1227  ;;  %vm1779_vm0 = vweird.f32 %v2451_v55 }
 0x3f8   : > { %v1771_v34 = vsel %vm1768_vm15, %v1770_v16, %v1766_v47  ;;  %2452 = vrcp.f32 %v1228_v18  ;;  %vm1780_vm2 = vmor %vm1778_vm1, %vm1779_vm0  ;;  %v1799_v32 = vand.u32 2147483648, %v1228_v18  ;;  %v1797_v40 = vand.u32 2147483647, %v1228_v18 }
 0x3f9   : > { %v1775_v61 = vsub.f32 1.0, %v1774_v13  ;;  %v1772_v28 = vmul.f32 %v1771_v34, %v1447_v35  ;;  %vm1793_vm5 = vweird.f32 %v1228_v18  ;;  %v2483_v35 = vld [vmem:[%s2613_s30 + $0x20] sm:$0xff] }
 0x3fa   : > { %v1800_v3 = vor.u32 1.1754944e-38, %v1799_v32  ;;  %vm1798_vm7 = vcmp.eq.f32.partialorder %v1797_v40, 8.507059e+37 }
 0x3fb   : > { %v1776_v45 = vmul.f32 %v2451_v55, %v1775_v61  ;;  %2058 = vmatmul.f32.gmra.mxu3 %v1772_v28 }
 0x3fd   : > { %v1449_v57 = vpop.f32.mrf.mxu2  ;;  %v1777_v53 = vadd.f32 %v2451_v55, %v1776_v45 }
 0x3fe   : > { %v2453_v22 = vpop.eup %2452  ;;  %v1450_v12 = vadd.f32 %v1449_v57, %v1336_v24  ;;  %v1339_v43 = vpop.f32.mrf.mxu1 }
 0x3ff   : > { %v1789_v54 = vmul.f32 %v2453_v22, %v1228_v18  ;;  %v1781_v44 = vsel %vm1780_vm2, %v2451_v55, %v1777_v53  ;;  %v1231_v21 = vpop.xlane.xlu2 %1230  ;;  %vm1794_vm4 = vweird.f32 %v2453_v22 }
 0x400   : > { %v1786_v37 = vsel %vm1783_vm3, %v1785_v23, %v1781_v44  ;;  %2454 = vrcp.f32 %v1231_v21  ;;  %vm1795_vm6 = vmor %vm1793_vm5, %vm1794_vm4  ;;  %v1814_v10 = vand.u32 2147483648, %v1231_v21  ;;  %v1812_v38 = vand.u32 2147483647, %v1231_v21  ;;  %v2484_v44 = vld [vmem:[%s2613_s30 + $0x28] sm:$0xff] }
 0x401   : > { %v1790_v33 = vsub.f32 1.0, %v1789_v54  ;;  %v1787_v50 = vmul.f32 %v1786_v37, %v1450_v12  ;;  %vm1808_vm9 = vweird.f32 %v1231_v21 }
 0x402   : > { %v1815_v15 = vor.u32 1.1754944e-38, %v1814_v10  ;;  %vm1813_vm11 = vcmp.eq.f32.partialorder %v1812_v38, 8.507059e+37 }
 0x403   : > { %v1791_v58 = vmul.f32 %v2453_v22, %v1790_v33  ;;  %2061 = vmatmul.f32.gmra.mxu3 %v1787_v50 }
 0x405   : > { %v1452_v59 = vpop.f32.mrf.mxu2  ;;  %v1792_v31 = vadd.f32 %v2453_v22, %v1791_v58 }
 0x406   : > { %v2455_v46 = vpop.eup %2454  ;;  %v1453_v6 = vadd.f32 %v1452_v59, %v1339_v43  ;;  %v2014_v25 = vpop.f32.mrf.mxu3 }
 0x407   : > { %v1342_v11 = vpop.f32.mrf.mxu1  ;;  %v1804_v7 = vmul.f32 %v2455_v46, %v1231_v21  ;;  %v1796_v49 = vsel %vm1795_vm6, %v2453_v22, %v1792_v31  ;;  %v2015_v62 = vadd.f32 %v3663_v8, %v2014_v25  ;;  %v1234_v48 = vpop.xlane.xlu0 %1233  ;;  %vm1809_vm8 = vweird.f32 %v2455_v46 }
 0x408   : > { %v1801_v1 = vsel %vm1798_vm7, %v1800_v3, %v1796_v49  ;;  %2456 = vrcp.f32 %v1234_v48  ;;  %vm1810_vm10 = vmor %vm1808_vm9, %vm1809_vm8  ;;  %v1829_v24 = vand.u32 2147483648, %v1234_v48  ;;  %v1827_v47 = vand.u32 2147483647, %v1234_v48 }
 0x409   : > { %v1805_v30 = vsub.f32 1.0, %v1804_v7  ;;  %v1802_v42 = vmul.f32 %v1801_v1, %v1453_v6  ;;  %v2104_v27 = vadd.f32 %v2482_v29, %v2015_v62  ;;  %vm1823_vm13 = vweird.f32 %v1234_v48  ;;  %v2485_v1 = vld [vmem:[%s2613_s30 + $0x30] sm:$0xff] }
 0x40a   : > { %v1830_v5 = vor.u32 1.1754944e-38, %v1829_v24  ;;  %vm1828_vm15 = vcmp.eq.f32.partialorder %v1827_v47, 8.507059e+37 }
 0x40b   : > { %v1806_v60 = vmul.f32 %v2455_v46, %v1805_v30  ;;  %2136 = vst [vmem:[%s3671_s29 + $0x18] sm:$0xff] %v2104_v27  ;;  %2064 = vmatmul.f32.gmra.mxu3 %v1802_v42 }
 0x40d   : > { %v1455_v63 = vpop.f32.mrf.mxu2  ;;  %v1807_v41 = vadd.f32 %v2455_v46, %v1806_v60 }
 0x40e   : > { %v2457_v14 = vpop.eup %2456  ;;  %v1456_v52 = vadd.f32 %v1455_v63, %v1342_v11  ;;  %v2017_v51 = vpop.f32.mrf.mxu3 }
 0x40f   : > { %v1345_v2 = vpop.f32.mrf.mxu1  ;;  %v1819_v17 = vmul.f32 %v2457_v14, %v1234_v48  ;;  %v1811_v36 = vsel %vm1810_vm10, %v2455_v46, %v1807_v41  ;;  %v2018_v9 = vadd.f32 %v3663_v8, %v2017_v51  ;;  %v1237_v19 = vpop.xlane.xlu1 %1236  ;;  %vm1824_vm12 = vweird.f32 %v2457_v14 }
 0x410   : > { %v1816_v20 = vsel %vm1813_vm11, %v1815_v15, %v1811_v36  ;;  %2458 = vrcp.f32 %v1237_v19  ;;  %vm1825_vm14 = vmor %vm1823_vm13, %vm1824_vm12  ;;  %v1844_v37 = vand.u32 2147483648, %v1237_v19  ;;  %v1842_v50 = vand.u32 2147483647, %v1237_v19 }
 0x411   : > { %v1820_v4 = vsub.f32 1.0, %v1819_v17  ;;  %v1817_v55 = vmul.f32 %v1816_v20, %v1456_v52  ;;  %v2105_v16 = vadd.f32 %v2483_v35, %v2018_v9  ;;  %vm1838_vm1 = vweird.f32 %v1237_v19  ;;  %v2486_v20 = vld [vmem:[%s2613_s30 + $0x38] sm:$0xff] }
 0x412   : > { %v1845_v31 = vor.u32 1.1754944e-38, %v1844_v37  ;;  %vm1843_vm3 = vcmp.eq.f32.partialorder %v1842_v50, 8.507059e+37 }
 0x413   : > { %v1821_v13 = vmul.f32 %v2457_v14, %v1820_v4  ;;  %2137 = vst [vmem:[%s3671_s29 + $0x20] sm:$0xff] %v2105_v16  ;;  %2067 = vmatmul.f32.gmra.mxu3 %v1817_v55 }
 0x415   : > { %v1458_v18 = vpop.f32.mrf.mxu2  ;;  %v1822_v34 = vadd.f32 %v2457_v14, %v1821_v13 }
 0x416   : > { %v2459_v61 = vpop.eup %2458  ;;  %v1459_v28 = vadd.f32 %v1458_v18, %v1345_v2  ;;  %v2020_v45 = vpop.f32.mrf.mxu3 }
 0x417   : > { %v1348_v56 = vpop.f32.mrf.mxu1  ;;  %v1834_v57 = vmul.f32 %v2459_v61, %v1237_v19  ;;  %v1826_v53 = vsel %vm1825_vm14, %v2457_v14, %v1822_v34  ;;  %v2021_v22 = vadd.f32 %v3663_v8, %v2020_v45  ;;  %v1240_v12 = vpop.xlane.xlu2 %1239  ;;  %vm1839_vm0 = vweird.f32 %v2459_v61 }
 0x418   : > { %v1831_v23 = vsel %vm1828_vm15, %v1830_v5, %v1826_v53  ;;  %2460 = vrcp.f32 %v1240_v12  ;;  %vm1840_vm2 = vmor %vm1838_vm1, %vm1839_vm0  ;;  %v1859_v42 = vand.u32 2147483648, %v1240_v12  ;;  %v1857_v27 = vand.u32 2147483647, %v1240_v12 }
 0x419   : > { %v1835_v43 = vsub.f32 1.0, %v1834_v57  ;;  %v1832_v54 = vmul.f32 %v1831_v23, %v1459_v28  ;;  %v2106_v21 = vadd.f32 %v2484_v44, %v2021_v22  ;;  %vm1853_vm5 = vweird.f32 %v1240_v12  ;;  %v2487_v23 = vld [vmem:[%s2613_s30 + $0x40] sm:$0xff] }
 0x41a   : > { %v1860_v41 = vor.u32 1.1754944e-38, %v1859_v42  ;;  %vm1858_vm7 = vcmp.eq.f32.partialorder %v1857_v27, 8.507059e+37 }
 0x41b   : > { %v1836_v33 = vmul.f32 %v2459_v61, %v1835_v43  ;;  %2138 = vst [vmem:[%s3671_s29 + $0x28] sm:$0xff] %v2106_v21  ;;  %2070 = vmatmul.f32.gmra.mxu3 %v1832_v54 }
 0x41d   : > { %v1461_v32 = vpop.f32.mrf.mxu2  ;;  %v1837_v58 = vadd.f32 %v2459_v61, %v1836_v33 }
 0x41e   : > { %v2461_v40 = vpop.eup %2460  ;;  %v1462_v59 = vadd.f32 %v1461_v32, %v1348_v56  ;;  %v2023_v46 = vpop.f32.mrf.mxu3 }
 0x41f   : > { %v1351_v6 = vpop.f32.mrf.mxu1  ;;  %v1849_v3 = vmul.f32 %v2461_v40, %v1240_v12  ;;  %v1841_v25 = vsel %vm1840_vm2, %v2459_v61, %v1837_v58  ;;  %v2024_v11 = vadd.f32 %v3663_v8, %v2023_v46  ;;  %v1243_v7 = vpop.xlane.xlu0 %1242  ;;  %vm1854_vm4 = vweird.f32 %v2461_v40 }
 0x420   : > { %v1846_v49 = vsel %vm1843_vm3, %v1845_v31, %v1841_v25  ;;  %2462 = vrcp.f32 %v1243_v7  ;;  %vm1855_vm6 = vmor %vm1853_vm5, %vm1854_vm4  ;;  %v1874_v55 = vand.u32 2147483648, %v1243_v7  ;;  %v1872_v16 = vand.u32 2147483647, %v1243_v7 }
 0x421   : > { %v1850_v62 = vsub.f32 1.0, %v1849_v3  ;;  %v1847_v48 = vmul.f32 %v1846_v49, %v1462_v59  ;;  %v2107_v30 = vadd.f32 %v2485_v1, %v2024_v11  ;;  %vm1868_vm9 = vweird.f32 %v1243_v7  ;;  %v2488_v49 = vld [vmem:[%s2613_s30 + $0x48] sm:$0xff] }
 0x422   : > { %v1875_v34 = vor.u32 1.1754944e-38, %v1874_v55  ;;  %vm1873_vm11 = vcmp.eq.f32.partialorder %v1872_v16, 8.507059e+37 }
 0x423   : > { %v1851_v29 = vmul.f32 %v2461_v40, %v1850_v62  ;;  %2139 = vst [vmem:[%s3671_s29 + $0x30] sm:$0xff] %v2107_v30  ;;  %2073 = vmatmul.f32.gmra.mxu3 %v1847_v48 }
 0x425   : > { %v1464_v10 = vpop.f32.mrf.mxu2  ;;  %v1852_v60 = vadd.f32 %v2461_v40, %v1851_v29 }
 0x426   : > { %v2463_v38 = vpop.eup %2462  ;;  %v1465_v63 = vadd.f32 %v1464_v10, %v1351_v6  ;;  %v2026_v14 = vpop.f32.mrf.mxu3 }
 0x427   : > { %v1354_v52 = vpop.f32.mrf.mxu1  ;;  %v1864_v15 = vmul.f32 %v2463_v38, %v1243_v7  ;;  %v1856_v51 = vsel %vm1855_vm6, %v2461_v40, %v1852_v60  ;;  %v2027_v2 = vadd.f32 %v3663_v8, %v2026_v14  ;;  %v1246_v17 = vpop.xlane.xlu1 %1245  ;;  %vm1869_vm8 = vweird.f32 %v2463_v38 }
 0x428   : > { %v1861_v36 = vsel %vm1858_vm7, %v1860_v41, %v1856_v51  ;;  %2464 = vrcp.f32 %v1246_v17  ;;  %vm1870_vm10 = vmor %vm1868_vm9, %vm1869_vm8  ;;  %v1889_v54 = vand.u32 2147483648, %v1246_v17  ;;  %v1887_v21 = vand.u32 2147483647, %v1246_v17 }
 0x429   : > { %v1865_v9 = vsub.f32 1.0, %v1864_v15  ;;  %v1862_v19 = vmul.f32 %v1861_v36, %v1465_v63  ;;  %v2108_v4 = vadd.f32 %v2486_v20, %v2027_v2  ;;  %vm1883_vm13 = vweird.f32 %v1246_v17 }
 0x42a   : > { %v1890_v58 = vor.u32 1.1754944e-38, %v1889_v54  ;;  %vm1888_vm15 = vcmp.eq.f32.partialorder %v1887_v21, 8.507059e+37 }
 0x42b   : > { %v1866_v35 = vmul.f32 %v2463_v38, %v1865_v9  ;;  %2140 = vst [vmem:[%s3671_s29 + $0x38] sm:$0xff] %v2108_v4  ;;  %2076 = vmatmul.f32.gmra.mxu3 %v1862_v19  ;;  %v2489_v9 = vld [vmem:[%s2613_s30 + $0x50] sm:$0xff] }
 0x42d   : > { %v1467_v24 = vpop.f32.mrf.mxu2  ;;  %v1867_v13 = vadd.f32 %v2463_v38, %v1866_v35 }
 0x42e   : > { %v2465_v47 = vpop.eup %2464  ;;  %v1468_v18 = vadd.f32 %v1467_v24, %v1354_v52  ;;  %v2029_v61 = vpop.f32.mrf.mxu3 }
 0x42f   : > { %v1357_v28 = vpop.f32.mrf.mxu1  ;;  %v1879_v5 = vmul.f32 %v2465_v47, %v1246_v17  ;;  %v1871_v45 = vsel %vm1870_vm10, %v2463_v38, %v1867_v13  ;;  %v2030_v56 = vadd.f32 %v3663_v8, %v2029_v61  ;;  %v1249_v57 = vpop.xlane.xlu2 %1248  ;;  %vm1884_vm12 = vweird.f32 %v2465_v47 }
 0x430   : > { %v1876_v53 = vsel %vm1873_vm11, %v1875_v34, %v1871_v45  ;;  %2466 = vrcp.f32 %v1249_v57  ;;  %vm1885_vm14 = vmor %vm1883_vm13, %vm1884_vm12  ;;  %v1904_v48 = vand.u32 2147483648, %v1249_v57  ;;  %v1902_v30 = vand.u32 2147483647, %v1249_v57 }
 0x431   : > { %v1880_v22 = vsub.f32 1.0, %v1879_v5  ;;  %v1877_v12 = vmul.f32 %v1876_v53, %v1468_v18  ;;  %v2109_v43 = vadd.f32 %v2487_v23, %v2030_v56  ;;  %vm1898_vm1 = vweird.f32 %v1249_v57  ;;  %v2490_v23 = vld [vmem:[%s2613_s30 + $0x58] sm:$0xff] }
 0x432   : > { %v1905_v60 = vor.u32 1.1754944e-38, %v1904_v48  ;;  %vm1903_vm3 = vcmp.eq.f32.partialorder %v1902_v30, 8.507059e+37 }
 0x433   : > { %v1881_v44 = vmul.f32 %v2465_v47, %v1880_v22  ;;  %2141 = vst [vmem:[%s3671_s29 + $0x40] sm:$0xff] %v2109_v43  ;;  %2079 = vmatmul.f32.gmra.mxu3 %v1877_v12 }
 0x435   : > { %v1470_v37 = vpop.f32.mrf.mxu2  ;;  %v1882_v33 = vadd.f32 %v2465_v47, %v1881_v44 }
 0x436   : > { %v2467_v50 = vpop.eup %2466  ;;  %v1471_v32 = vadd.f32 %v1470_v37, %v1357_v28  ;;  %v2032_v40 = vpop.f32.mrf.mxu3 }
 0x437   : > { %v1360_v59 = vpop.f32.mrf.mxu1  ;;  %v1894_v31 = vmul.f32 %v2467_v50, %v1249_v57  ;;  %v1886_v46 = vsel %vm1885_vm14, %v2465_v47, %v1882_v33  ;;  %v2033_v6 = vadd.f32 %v3663_v8, %v2032_v40  ;;  %v1252_v3 = vpop.xlane.xlu0 %1251  ;;  %vm1899_vm0 = vweird.f32 %v2467_v50 }
 0x438   : > { %v1891_v25 = vsel %vm1888_vm15, %v1890_v58, %v1886_v46  ;;  %2468 = vrcp.f32 %v1252_v3  ;;  %vm1900_vm2 = vmor %vm1898_vm1, %vm1899_vm0  ;;  %v1919_v20 = vand.u32 2147483648, %v1252_v3  ;;  %v1917_v55 = vand.u32 2147483647, %v1252_v3 }
 0x439   : > { %v1895_v11 = vsub.f32 1.0, %v1894_v31  ;;  %v1892_v7 = vmul.f32 %v1891_v25, %v1471_v32  ;;  %v2110_v62 = vadd.f32 %v2488_v49, %v2033_v6  ;;  %vm1913_vm5 = vweird.f32 %v1252_v3 }
 0x43a   : > { %v1920_v47 = vor.u32 1.1754944e-38, %v1919_v20  ;;  %vm1918_vm7 = vcmp.eq.f32.partialorder %v1917_v55, 8.507059e+37 }
 0x43b   : > { %v1896_v1 = vmul.f32 %v2467_v50, %v1895_v11  ;;  %2142 = vst [vmem:[%s3671_s29 + $0x48] sm:$0xff] %v2110_v62  ;;  %2082 = vmatmul.f32.gmra.mxu3 %v1892_v7 }
 0x43d   : > { %v1473_v42 = vpop.f32.mrf.mxu2  ;;  %v1897_v29 = vadd.f32 %v2467_v50, %v1896_v1 }
 0x43e   : > { %v2469_v27 = vpop.eup %2468  ;;  %v1474_v10 = vadd.f32 %v1473_v42, %v1360_v59  ;;  %v2035_v38 = vpop.f32.mrf.mxu3 }
 0x43f   : > { %v1909_v63 = vmul.f32 %v2469_v27, %v1252_v3  ;;  %v1901_v41 = vsel %vm1900_vm2, %v2467_v50, %v1897_v29  ;;  %v2036_v14 = vadd.f32 %v3663_v8, %v2035_v38  ;;  %v1174_v52 = vpop.xlane.xlu0 %1173  ;;  %v3694_v15 = vpop.xlane.xlu1 %1254  ;;  %vm1914_vm4 = vweird.f32 %v2469_v27 }
 0x440   : > { %v1906_v51 = vsel %vm1903_vm3, %v1905_v60, %v1901_v41  ;;  %v1363_v2 = vpop.f32.mrf.mxu1  ;;  %2470 = vrcp.f32 %v1174_v52  ;;  %vm1915_vm6 = vmor %vm1913_vm5, %vm1914_vm4  ;;  %v1527_v54 = vand.u32 2147483647, %v1174_v52  ;;  %v1529_v44 = vand.u32 2147483648, %v1174_v52 }
 0x441   : > { %v1910_v17 = vsub.f32 1.0, %v1909_v63  ;;  %v1907_v36 = vmul.f32 %v1906_v51, %v1474_v10  ;;  %v2111_v19 = vadd.f32 %v2489_v9, %v2036_v14  ;;  %2472 = vrcp.f32 %v3694_v15 }
 0x442   : > { %v1932_v37 = vand.u32 2147483647, %v3694_v15  ;;  %v1934_v32 = vand.u32 2147483648, %v3694_v15  ;;  %vm1523_vm9 = vweird.f32 %v1174_v52  ;;  %vm3715_vm12 = vcmp.eq.f32.partialorder %v1527_v54, 8.507059e+37  ;;  %v2492_v54 = vld [vmem:[%s2613_s30 + $0x68] sm:$0xff] }
 0x443   : > { %v1911_v4 = vmul.f32 %v2469_v27, %v1910_v17  ;;  %2143 = vst [vmem:[%s3671_s29 + $0x50] sm:$0xff] %v2111_v19  ;;  %2085 = vmatmul.f32.gmra.mxu3 %v1907_v36  ;;  %v1530_v3 = vor.u32 1.1754944e-38, %v1529_v44  ;;  %vm1928_vm13 = vweird.f32 %v3694_v15 }
 0x444   : > { %vm3720_vm14 = vcmp.eq.f32.partialorder %v1932_v37, 8.507059e+37 }
 0x445   : > { %v1476_v35 = vpop.f32.mrf.mxu2  ;;  %v1912_v16 = vadd.f32 %v2469_v27, %v1911_v4 }
 0x446   : > { %v2471_v24 = vpop.eup %2470  ;;  %v1477_v13 = vadd.f32 %v1476_v35, %v1363_v2  ;;  %v2038_v18 = vpop.f32.mrf.mxu3 }
 0x447   : > { %v1519_v34 = vmul.f32 %v2471_v24, %v1174_v52  ;;  %v1916_v61 = vsel %vm1915_vm6, %v2469_v27, %v1912_v16  ;;  %v2039_v28 = vadd.f32 %v3663_v8, %v2038_v18  ;;  %v3700_v5 = vpop.xlane.xlu0 %1170  ;;  %v3702_v45 = vpop.xlane.xlu2 %1257  ;;  %vm1524_vm8 = vweird.f32 %v2471_v24 }
 0x448   : > { %v2473_v56 = vpop.eup %2472  ;;  %v1921_v57 = vsel %vm1918_vm7, %v1920_v47, %v1916_v61  ;;  %2474 = vrcp.f32 %v3700_v5  ;;  %v1366_v21 = vpop.f32.mrf.mxu1  ;;  %vm3711_vm11 = vmor %vm1523_vm9, %vm1524_vm8  ;;  %v1512_v29 = vand.u32 2147483647, %v3700_v5  ;;  %v1935_v27 = vor.u32 1.1754944e-38, %v1934_v32 }
 0x449   : > { %v1520_v53 = vsub.f32 1.0, %v1519_v34  ;;  %v1924_v22 = vmul.f32 %v2473_v56, %v3694_v15  ;;  %v1922_v12 = vmul.f32 %v1921_v57, %v1477_v13  ;;  %v2112_v43 = vadd.f32 %v2490_v23, %v2039_v28  ;;  %v2491_v15 = vld [vmem:[%s2613_s30 + $0x60] sm:$0xff] }
 0x44a   : > { %2476 = vrcp.f32 %v3702_v45  ;;  %vm1929_vm10 = vweird.f32 %v2473_v56  ;;  %v1514_v38 = vand.u32 2147483648, %v3700_v5  ;;  %vm1508_vm1 = vweird.f32 %v3700_v5 }
 0x44b   : > { %v1521_v33 = vmul.f32 %v2471_v24, %v1520_v53  ;;  %v1925_v50 = vsub.f32 1.0, %v1924_v22  ;;  %2144 = vst [vmem:[%s3671_s29 + $0x58] sm:$0xff] %v2112_v43  ;;  %2088 = vmatmul.f32.gmra.mxu3 %v1922_v12  ;;  %vm1930_vm15 = vmor %vm1928_vm13, %vm1929_vm10  ;;  %v1947_v19 = vand.u32 2147483647, %v3702_v45  ;;  %v1949_v16 = vand.u32 2147483648, %v3702_v45 }
 0x44c   : > { %vm1513_vm3 = vcmp.eq.f32.partialorder %v1512_v29, 8.507059e+37  ;;  %v1515_v13 = vor.u32 1.1754944e-38, %v1514_v38  ;;  %vm1943_vm5 = vweird.f32 %v3702_v45  ;;  %v2494_v38 = vld [vmem:[%s2613_s30 + $0x78] sm:$0xff] }
 0x44d   : > { %v1522_v58 = vadd.f32 %v2471_v24, %v1521_v33  ;;  %v1926_v40 = vmul.f32 %v2473_v56, %v1925_v50  ;;  %v1479_v59 = vpop.f32.mrf.mxu2  ;;  %vm1948_vm6 = vcmp.eq.f32.partialorder %v1947_v19, 8.507059e+37  ;;  %v2497_v19 = vld [vmem:[%s2613_s30 + $0x90] sm:$0xff] }
 0x44e   : > { %v2475_v31 = vpop.eup %2474  ;;  %v2041_v11 = vpop.f32.mrf.mxu3  ;;  %v1480_v62 = vadd.f32 %v1479_v59, %v1366_v21 }
 0x44f   : > { %v1526_v7 = vsel %vm3711_vm11, %v2471_v24, %v1522_v58  ;;  %v1504_v49 = vmul.f32 %v2475_v31, %v3700_v5  ;;  %v1927_v48 = vadd.f32 %v2473_v56, %v1926_v40  ;;  %v3727_v1 = vpop.xlane.xlu2 %1167  ;;  %v3729_v30 = vpop.xlane.xlu1 %1260  ;;  %v2042_v10 = vadd.f32 %v3663_v8, %v2041_v11 }
 0x450   : > { %v2477_v42 = vpop.eup %2476  ;;  %2478 = vrcp.f32 %v3727_v1  ;;  %v1531_v14 = vsel %vm3715_vm12, %v1530_v3, %v1526_v7  ;;  %vm1509_vm0 = vweird.f32 %v2475_v31  ;;  %v1369_v9 = vpop.f32.mrf.mxu1  ;;  %v1497_v12 = vand.u32 2147483647, %v3727_v1 }
 0x451   : > { %v1505_v60 = vsub.f32 1.0, %v1504_v49  ;;  %v1939_v63 = vmul.f32 %v2477_v42, %v3702_v45  ;;  %v1931_v41 = vsel %vm1930_vm15, %v2473_v56, %v1927_v48  ;;  %v2113_v51 = vadd.f32 %v2491_v15, %v2042_v10  ;;  %vm1510_vm2 = vmor %vm1508_vm1, %vm1509_vm0 }
 0x452   : > { %v1936_v52 = vsel %vm3720_vm14, %v1935_v27, %v1931_v41  ;;  %2480 = vrcp.f32 %v3729_v30  ;;  %v1532_v55 = vmul.f32 %v1531_v14, %v3554_v0  ;;  %vm1944_vm4 = vweird.f32 %v2477_v42  ;;  %v2495_v14 = vld [vmem:[%s2613_s30 + $0x80] sm:$0xff] }
 0x453   : > { %v1506_v2 = vmul.f32 %v2475_v31, %v1505_v60  ;;  %v1940_v17 = vsub.f32 1.0, %v1939_v63  ;;  %v1937_v36 = vmul.f32 %v1936_v52, %v1480_v62  ;;  %2145 = vst [vmem:[%s3671_s29 + $0x60] sm:$0xff] %v2113_v51  ;;  %vm1945_vm7 = vmor %vm1943_vm5, %vm1944_vm4  ;;  %v1950_v45 = vor.u32 1.1754944e-38, %v1949_v16 }
 0x454   : > { %2010 = vmatmul.f32.vlgmr.msra.gmra.mxu2 %v1532_v55  ;;  %v1499_v23 = vand.u32 2147483648, %v3727_v1  ;;  %vm1493_vm9 = vweird.f32 %v3727_v1  ;;  %v1962_v40 = vand.u32 2147483647, %v3729_v30  ;;  %vm1498_vm12 = vcmp.eq.f32.partialorder %v1497_v12, 8.507059e+37  ;;  %v2502_v12 = vld [vmem:[%s2613_s30 + $0xb8] sm:$0xff] }
 0x455   : > { %v1507_v20 = vadd.f32 %v2475_v31, %v1506_v2  ;;  %v1941_v4 = vmul.f32 %v2477_v42, %v1940_v17  ;;  %2091 = vmatmul.f32.gmra.mxu3 %v1937_v36  ;;  %v1482_v35 = vpop.f32.mrf.mxu2  ;;  %vm1958_vm13 = vweird.f32 %v3729_v30  ;;  %v2496_v2 = vld [vmem:[%s2613_s30 + $0x88] sm:$0xff] }
 0x456   : > { %v2479_v24 = vpop.eup %2478  ;;  %v2044_v47 = vpop.f32.mrf.mxu3  ;;  %v1483_v5 = vadd.f32 %v1482_v35, %v1369_v9  ;;  %vm1963_vm15 = vcmp.eq.f32.partialorder %v1962_v40, 8.507059e+37  ;;  %v2498_v35 = vld [vmem:[%s2613_s30 + $0x98] sm:$0xff]  ;;  %v2505_v40 = vld [vmem:[%s2613_s30 + $0xd0] sm:$0xff] }
 0x457   : > { %v1511_v18 = vsel %vm1510_vm2, %v2475_v31, %v1507_v20  ;;  %v1489_v34 = vmul.f32 %v2479_v24, %v3727_v1  ;;  %v1942_v61 = vadd.f32 %v2477_v42, %v1941_v4  ;;  %v2045_v56 = vadd.f32 %v3663_v8, %v2044_v47  ;;  %v2499_v47 = vld [vmem:[%s2613_s30 + $0xa0] sm:$0xff] }
 0x458   : > { %v2481_v28 = vpop.eup %2480  ;;  %v1516_v0 = vsel %vm1513_vm3, %v1515_v13, %v1511_v18  ;;  %vm1494_vm8 = vweird.f32 %v2479_v24  ;;  %v1500_v31 = vor.u32 1.1754944e-38, %v1499_v23  ;;  %v1372_v46 = vpop.f32.mrf.mxu1 }
 0x459   : > { %v1517_v57 = vmul.f32 %v1516_v0, %v3550_v39  ;;  %v1490_v53 = vsub.f32 1.0, %v1489_v34  ;;  %v1954_v22 = vmul.f32 %v2481_v28, %v3729_v30  ;;  %v1946_v43 = vsel %vm1945_vm7, %v2477_v42, %v1942_v61  ;;  %vm1495_vm11 = vmor %vm1493_vm9, %vm1494_vm8 }
 0x45a   : > { %v2114_v44 = vadd.f32 %v2492_v54, %v2045_v56  ;;  %v1951_v33 = vsel %vm1948_vm6, %v1950_v45, %v1946_v43  ;;  %v1964_v39 = vand.u32 2147483648, %v3729_v30  ;;  %vm1959_vm10 = vweird.f32 %v2481_v28  ;;  %v2493_v30 = vld [vmem:[%s2613_s30 + $0x70] sm:$0xff] }
 0x45b   : > { %v1491_v21 = vmul.f32 %v2479_v24, %v1490_v53  ;;  %v1955_v37 = vsub.f32 1.0, %v1954_v22  ;;  %2007 = vmatmul.f32.vlgmr.msra.gmra.mxu1 %v1517_v57  ;;  %v1952_v50 = vmul.f32 %v1951_v33, %v1483_v5  ;;  %vm1960_vm14 = vmor %vm1958_vm13, %vm1959_vm10  ;;  %v2501_v57 = vld [vmem:[%s2613_s30 + $0xb0] sm:$0xff] }
 0x45c   : > { %2146 = vst [vmem:[%s3671_s29 + $0x68] sm:$0xff] %v2114_v44  ;;  %v1965_v62 = vor.u32 1.1754944e-38, %v1964_v39  ;;  %v2503_v44 = vld [vmem:[%s2613_s30 + $0xc0] sm:$0xff]  ;;  %v2504_v39 = vld [vmem:[%s2613_s30 + $0xc8] sm:$0xff] }
 0x45d   : > { %v1492_v32 = vadd.f32 %v2479_v24, %v1491_v21  ;;  %v1956_v58 = vmul.f32 %v2481_v28, %v1955_v37  ;;  %v1485_v59 = vpop.f32.mrf.mxu2  ;;  %2094 = vmatmul.f32.gmra.mxu3 %v1952_v50 }
 0x45e   : > { %v2047_v6 = vpop.f32.mrf.mxu3  ;;  %v1486_v25 = vadd.f32 %v1485_v59, %v1372_v46 }
 0x45f   : > { %v1496_v3 = vsel %vm1495_vm11, %v2479_v24, %v1492_v32  ;;  %v1957_v11 = vadd.f32 %v2481_v28, %v1956_v58  ;;  %v2048_v7 = vadd.f32 %v3663_v8, %v2047_v6  ;;  %v2506_v6 = vld [vmem:[%s2613_s30 + $0xd8] sm:$0xff] }
 0x460   : > { %v1501_v49 = vsel %vm1498_vm12, %v1500_v31, %v1496_v3 }
 0x461   : > { %v1502_v48 = vmul.f32 %v1501_v49, %v3546_v26  ;;  %v1961_v1 = vsel %vm1960_vm14, %v2481_v28, %v1957_v11  ;;  %v2115_v42 = vadd.f32 %v2493_v30, %v2048_v7  ;;  %v2500_v28 = vld [vmem:[%s2613_s30 + $0xa8] sm:$0xff]  ;;  %v2507_v7 = vld [vmem:[%s2613_s30 + $0xe0] sm:$0xff] }
 0x462   : > { %v1966_v29 = vsel %vm1963_vm15, %v1965_v62, %v1961_v1 }
 0x463   : > { %v1967_v27 = vmul.f32 %v1966_v29, %v1486_v25  ;;  %2147 = vst [vmem:[%s3671_s29 + $0x70] sm:$0xff] %v2115_v42  ;;  %2004 = vmatmul.f32.vlgmr.msra.gmra.mxu0 %v1502_v48 }
 0x465   : > { %2097 = vmatmul.f32.gmra.mxu3 %v1967_v27  ;;  %v2508_v27 = vld [vmem:[%s2613_s30 + $0xe8] sm:$0xff] }
 0x466   : > { %v2050_v10 = vpop.f32.mrf.mxu3 }
 0x467   : > { %v2051_v60 = vadd.f32 %v3663_v8, %v2050_v10 }
 0x469   : > { %v2116_v63 = vadd.f32 %v2494_v38, %v2051_v60  ;;  %v2509_v60 = vld [vmem:[%s2613_s30 + $0x8] sm:$0xff] }
 0x46b   : > { %2148 = vst [vmem:[%s3671_s29 + $0x78] sm:$0xff] %v2116_v63  ;;  %v2510_v63 = vld [vmem:[%s2613_s30 + $0x10] sm:$0xff] }
 0x46e   : > { %v2053_v26 = vpop.f32.mrf.mxu3 }
 0x46f   : > { %v2054_v41 = vadd.f32 %v3663_v8, %v2053_v26 }
 0x471   : > { %v2117_v52 = vadd.f32 %v2495_v14, %v2054_v41 }
 0x473   : > { %2149 = vst [vmem:[%s3671_s29 + $0x80] sm:$0xff] %v2117_v52 }
 0x476   : > { %v2056_v15 = vpop.f32.mrf.mxu3 }
 0x477   : > { %v2057_v51 = vadd.f32 %v3663_v8, %v2056_v15 }
 0x479   : > { %v2118_v17 = vadd.f32 %v2496_v2, %v2057_v51  ;;  %v2511_v51 = vld [vmem:[%s2613_s30] sm:$0xff] }
 0x47b   : > { %2150 = vst [vmem:[%s3671_s29 + $0x88] sm:$0xff] %v2118_v17  ;;  %v2512_v17 = vld [vmem:[%s2613_s30 + $0xf0] sm:$0xff] }
 0x47e   : > { %v2059_v36 = vpop.f32.mrf.mxu3 }
 0x47f   : > { %v2060_v9 = vadd.f32 %v3663_v8, %v2059_v36 }
 0x481   : > { %v2119_v20 = vadd.f32 %v2497_v19, %v2060_v9 }
 0x483   : > { %2151 = vst [vmem:[%s3671_s29 + $0x90] sm:$0xff] %v2119_v20  ;;  %v2513_v20 = vld [vmem:[%s2613_s30 + $0xf8] sm:$0xff] }
 0x486   : > { %v2062_v4 = vpop.f32.mrf.mxu3 }
 0x487   : > { %v2063_v55 = vadd.f32 %v3663_v8, %v2062_v4 }
 0x489   : > { %v2120_v16 = vadd.f32 %v2498_v35, %v2063_v55 }
 0x48b   : > { %2152 = vst [vmem:[%s3671_s29 + $0x98] sm:$0xff] %v2120_v16 }
 0x48e   : > { %v2065_v24 = vpop.f32.mrf.mxu3 }
 0x48f   : > { %v2066_v13 = vadd.f32 %v3663_v8, %v2065_v24 }
 0x491   : > { %v2121_v18 = vadd.f32 %v2499_v47, %v2066_v13 }
 0x493   : > { %2153 = vst [vmem:[%s3671_s29 + $0xa0] sm:$0xff] %v2121_v18 }
 0x496   : > { %v2068_v34 = vpop.f32.mrf.mxu3 }
 0x497   : > { %v2069_v61 = vadd.f32 %v3663_v8, %v2068_v34 }
 0x499   : > { %v2122_v0 = vadd.f32 %v2500_v28, %v2069_v61 }
 0x49b   : > { %2154 = vst [vmem:[%s3671_s29 + $0xa8] sm:$0xff] %v2122_v0 }
 0x49e   : > { %v2071_v5 = vpop.f32.mrf.mxu3 }
 0x49f   : > { %v2072_v56 = vadd.f32 %v3663_v8, %v2071_v5 }
 0x4a1   : > { %v2123_v53 = vadd.f32 %v2501_v57, %v2072_v56 }
 0x4a3   : > { %2155 = vst [vmem:[%s3671_s29 + $0xb0] sm:$0xff] %v2123_v53 }
 0x4a6   : > { %v2074_v22 = vpop.f32.mrf.mxu3 }
 0x4a7   : > { %v2075_v45 = vadd.f32 %v3663_v8, %v2074_v22 }
 0x4a9   : > { %v2124_v23 = vadd.f32 %v2502_v12, %v2075_v45 }
 0x4ab   : > { %2156 = vst [vmem:[%s3671_s29 + $0xb8] sm:$0xff] %v2124_v23 }
 0x4ae   : > { %v2077_v43 = vpop.f32.mrf.mxu3 }
 0x4af   : > { %v2078_v54 = vadd.f32 %v3663_v8, %v2077_v43 }
 0x4b1   : > { %v2125_v21 = vadd.f32 %v2503_v44, %v2078_v54 }
 0x4b3   : > { %2157 = vst [vmem:[%s3671_s29 + $0xc0] sm:$0xff] %v2125_v21 }
 0x4b6   : > { %v2080_v37 = vpop.f32.mrf.mxu3 }
 0x4b7   : > { %v2081_v33 = vadd.f32 %v3663_v8, %v2080_v37 }
 0x4b9   : > { %v2126_v50 = vadd.f32 %v2504_v39, %v2081_v33 }
 0x4bb   : > { %2158 = vst [vmem:[%s3671_s29 + $0xc8] sm:$0xff] %v2126_v50 }
 0x4be   : > { %v2083_v32 = vpop.f32.mrf.mxu3 }
 0x4bf   : > { %v2084_v58 = vadd.f32 %v3663_v8, %v2083_v32 }
 0x4c1   : > { %v2127_v59 = vadd.f32 %v2505_v40, %v2084_v58 }
 0x4c3   : > { %2159 = vst [vmem:[%s3671_s29 + $0xd0] sm:$0xff] %v2127_v59 }
 0x4c6   : > { %v2086_v31 = vpop.f32.mrf.mxu3 }
 0x4c7   : > { %v2087_v46 = vadd.f32 %v3663_v8, %v2086_v31 }
 0x4c9   : > { %v2128_v3 = vadd.f32 %v2506_v6, %v2087_v46 }
 0x4cb   : > { %2160 = vst [vmem:[%s3671_s29 + $0xd8] sm:$0xff] %v2128_v3 }
 0x4ce   : > { %v2089_v25 = vpop.f32.mrf.mxu3 }
 0x4cf   : > { %v2090_v11 = vadd.f32 %v3663_v8, %v2089_v25 }
 0x4d1   : > { %v2129_v49 = vadd.f32 %v2507_v7, %v2090_v11 }
 0x4d3   : > { %2161 = vst [vmem:[%s3671_s29 + $0xe0] sm:$0xff] %v2129_v49 }
 0x4d7   : > { %v2011_v42 = vpop.f32.mrf.mxu2 }
 0x4d8   : > { %v2092_v62 = vpop.f32.mrf.mxu3  ;;  %v2008_v48 = vpop.f32.mrf.mxu1  ;;  %v2012_v29 = vadd.f32 %v3663_v8, %v2011_v42 }
 0x4d9   : > { %v2093_v1 = vadd.f32 %v3663_v8, %v2092_v62  ;;  %v2009_v30 = vadd.f32 %v3663_v8, %v2008_v48 }
 0x4da   : > { %v2103_v26 = vadd.f32 %v2510_v63, %v2012_v29 }
 0x4db   : > { %v2130_v10 = vadd.f32 %v2508_v27, %v2093_v1  ;;  %v2102_v38 = vadd.f32 %v2509_v60, %v2009_v30 }
 0x4dc   : > { %2135 = vst [vmem:[%s3671_s29 + $0x10] sm:$0xff] %v2103_v26 }
 0x4dd   : > { %2162 = vst [vmem:[%s3671_s29 + $0xe8] sm:$0xff] %v2130_v10 }
 0x4de   : > { %2134 = vst [vmem:[%s3671_s29 + $0x8] sm:$0xff] %v2102_v38 }
 0x4e0   : > { %v2005_v41 = vpop.f32.mrf.mxu0  ;;  %v2095_v14 = vpop.f32.mrf.mxu3 }
 0x4e1   : > { %v2006_v52 = vadd.f32 %v3663_v8, %v2005_v41  ;;  %v2096_v15 = vadd.f32 %v3663_v8, %v2095_v14 }
 0x4e3   : > { %v2101_v2 = vadd.f32 %v2511_v51, %v2006_v52  ;;  %v2131_v36 = vadd.f32 %v2512_v17, %v2096_v15 }
 0x4e5   : > { %2133 = vst [vmem:[%s3671_s29] sm:$0xff] %v2101_v2 }
 0x4e6   : > { %2163 = vst [vmem:[%s3671_s29 + $0xf0] sm:$0xff] %v2131_v36 }
 0x4e8   : > { %v2098_v9 = vpop.f32.mrf.mxu3 }
 0x4e9   : > { %v2099_v19 = vadd.f32 %v3663_v8, %v2098_v9 }
 0x4eb   : > { %v2132_v4 = vadd.f32 %v2513_v20, %v2099_v19 }
 0x4ed   : > { %2164 = vst [vmem:[%s3671_s29 + $0xf8] sm:$0xff] %v2132_v4 }
 0x4ee PF: > { %s15_s18 = sadd.s32 1, %s2520_s18  }
 0x4ef   : > { %p12_p4 = scmp.ge.s32.totalorder %s15_s18, 4  }
 0x4f1   :  { %14 = sbr.rel (!%p12_p4) target bundleno = 1 (0x1), region = 70 }

</bundles_post_ra>
